<compile_context>
chip_gen: v5e
topology: v5e:2x2
jax: 0.10.0
libtpu: 0.0.40
codegen_flags: <defaults>
</compile_context>

<pallas_src>
import functools
import math

import jax
import jax.numpy as jnp
from jax.experimental import pallas as pl
from jax.experimental.pallas import tpu as pltpu


# --------------------------------------------------------------------------------------
# Config (small but consistent with the module)
# --------------------------------------------------------------------------------------
HIDDEN_DIM = 32          # transformer.d_model
NUM_HEADS = 8            # CrossAttention heads (head_dim = 4)
NUM_QUERIES = 8          # curve queries
OUT_PTS = 4              # keypoint queries
NUM_CLASSES = 4
CPTS = 2                 # -> curve_points_embed output dim = 2*cpts = 4
PTS_CLASS = 3
NUM_DEC_LAYERS = 2       # transformer.decoder.num_layers (num_pred)
NUM_FEATURE_LEVELS = 1
BACKBONE_CHANNELS = 64
IMG_H = IMG_W = 32
BATCH = 2
GN_GROUPS = 32
GN_EPS = 1e-5
HEAD_OUT_W = 128         # lane-dense packed output width of the fused head


# --------------------------------------------------------------------------------------
# Kernel 1: 1x1 conv + GroupNorm(32, hidden)   (input_proj), whole batch in one grid step
# --------------------------------------------------------------------------------------
def _conv1x1_gn_kernel(x_ref, w_ref, b_ref, g_ref, bt_ref, o_ref, *, batch, hw, groups, eps):
    x = x_ref[...]                                                                    # [B*HW, Cin]
    y = jnp.dot(x, w_ref[...], preferred_element_type=jnp.float32) + b_ref[...]      # [B*HW, C]
    C = y.shape[-1]
    cg = C // groups
    g = g_ref[...]
    bt = bt_ref[...]
    for bidx in range(batch):        # static unroll (batch=2): per-image GroupNorm statistics
        yb = y[bidx * hw:(bidx + 1) * hw, :]                                          # [HW, C]
        if cg == 1:
            # groups == channels: group stats ARE per-channel stats (centered two-pass)
            mean = jnp.mean(yb, axis=0, keepdims=True)
            var = jnp.mean((yb - mean) ** 2, axis=0, keepdims=True)
        else:
            # general path (channels-per-group > 1); not traced for this configuration
            yg = yb.reshape(hw, groups, cg)
            mg = jnp.mean(yg, axis=(0, 2), keepdims=True)
            vg = jnp.mean((yg - mg) ** 2, axis=(0, 2), keepdims=True)
            mean = jnp.broadcast_to(mg, (1, groups, cg)).reshape(1, C)
            var = jnp.broadcast_to(vg, (1, groups, cg)).reshape(1, C)
        yn = (yb - mean) * jax.lax.rsqrt(var + eps)
        o_ref[bidx] = yn * g + bt


def conv1x1_groupnorm(x_nhwc, w, b, gamma, beta, groups=GN_GROUPS, eps=GN_EPS):
    B, H, W, Cin = x_nhwc.shape
    Cout = w.shape[1]
    hw = H * W
    xf = x_nhwc.reshape(B * hw, Cin)
    out = pl.pallas_call(
        functools.partial(_conv1x1_gn_kernel, batch=B, hw=hw, groups=groups, eps=eps),
        out_shape=jax.ShapeDtypeStruct((B, hw, Cout), jnp.float32),
        grid=(1,),
        in_specs=[
            pl.BlockSpec((B * hw, Cin), lambda i: (0, 0)),
            pl.BlockSpec((Cin, Cout), lambda i: (0, 0)),
            pl.BlockSpec((1, Cout), lambda i: (0, 0)),
            pl.BlockSpec((1, Cout), lambda i: (0, 0)),
            pl.BlockSpec((1, Cout), lambda i: (0, 0)),
        ],
        out_specs=pl.BlockSpec((B, hw, Cout), lambda i: (0, 0, 0)),
        compiler_params=pltpu.CompilerParams(dimension_semantics=("arbitrary",)),
    )(xf, w, b.reshape(1, Cout), gamma.reshape(1, Cout), beta.reshape(1, Cout))
    return out.reshape(B, H, W, Cout)


# --------------------------------------------------------------------------------------
# Kernel 2: fused {multi-head cross attention + residual + class embed + MLP head +
#           inverse_sigmoid/sigmoid coord math}.  One grid step per problem
#           (p=0: curve-enhance+curve head, p=1: keypoint-enhance+keypoint head).
#           All decoder levels / batch elements handled in the single step:
#           heads and (l,b) context rows are packed on the lane axis (HN = H*L*B*Ncp).
# --------------------------------------------------------------------------------------
def _fused_xattn_head_kernel(x_ref, ctx_ref, refs_ref, vmask_ref, hmask_ref,
                             wq_ref, bq_ref, wkv_ref, bkv_ref, wo_ref, bo_ref,
                             cls_w_ref, cls_b_ref, *rest,
                             num_heads, n_mlp_layers, scale, eps=1e-5):
    wb = rest[:2 * n_mlp_layers]
    hp_ref = rest[2 * n_mlp_layers]
    o_ref = rest[2 * n_mlp_layers + 1]

    x = x_ref[...]                                       # [M, D]   M = L*B*Nq_pad
    ctx = ctx_ref[...]                                   # [M, D]   context rows, same packing
    D = x.shape[-1]

    # ---- projections (K|V packed into one GEMM) ----------------------------------------
    q = jnp.dot(x, wq_ref[...], preferred_element_type=jnp.float32) + bq_ref[...]      # [M, D]
    kv = jnp.dot(ctx, wkv_ref[...], preferred_element_type=jnp.float32) + bkv_ref[...]  # [M, 2D]
    k = kv[:, :D]
    v = kv[:, D:]

    # ---- heads packed on lanes: lane = h*(L*B*Ncp) + (lb*Ncp + j) -----------------------
    hmask = hmask_ref[...]                               # [HN, D]  (lane//LBNc == c//hd)
    kt = jnp.concatenate([k] * num_heads, axis=0) * hmask        # [HN, D]
    vb = jnp.concatenate([v] * num_heads, axis=0) * hmask        # [HN, D]

    # scores s[r, lane] = <q_h(r), k_h(m)> * scale   (dot_general "NT": no transpose op)
    s = jax.lax.dot_general(q, kt, (((1,), (1,)), ((), ())),
                            preferred_element_type=jnp.float32) * scale                # [M, HN]
    # mask: only context rows of the SAME (l, b) and within the valid context length
    s = jnp.where(vmask_ref[...] > 0.0, s, -1e30)
    p = jnp.exp(s - jnp.max(s, axis=-1, keepdims=True))                                # [M, HN]
    # dropout on attention probs: identity (inference semantics)

    out_un = jnp.dot(p, vb, preferred_element_type=jnp.float32)                        # [M, D]
    denom = jnp.dot(p, hmask, preferred_element_type=jnp.float32)                      # [M, D]
    attn = out_un / denom                                 # exact per-head softmax normalization

    attn = jnp.dot(attn, wo_ref[...], preferred_element_type=jnp.float32) + bo_ref[...]
    z = attn + x                                          # residual

    # ---- prediction head: class embed + MLP + reference coord math, 128-wide slab ------
    logits = jnp.dot(z, cls_w_ref[...], preferred_element_type=jnp.float32) + cls_b_ref[...]
    h = z
    for i in range(n_mlp_layers):
        h = jnp.dot(h, wb[2 * i][...], preferred_element_type=jnp.float32) + wb[2 * i + 1][...]
        if i < n_mlp_layers - 1:
            h = jnp.maximum(h, 0.0)

    # inverse_sigmoid(reference), then add to coord columns (x/y tiled) and sigmoid
    r = jnp.clip(refs_ref[...], 0.0, 1.0)                 # [M, 2]
    inv = jnp.log(jnp.maximum(r, eps) / jnp.maximum(1.0 - r, eps))
    inv0 = inv[:, 0:1]
    inv1 = inv[:, 1:2]

    hp = hp_ref[...]                                      # [4, 128]: sel0|sel1|scale|shift
    sel0, sel1 = hp[0:1, :], hp[1:2, :]
    scl, sft = hp[2:3, :], hp[3:4, :]
    t = h + sel0 * inv0 + sel1 * inv1
    # coord cols: sigmoid (direction cols: *2-1 via scale/shift); cls cols: logits; rest: 0
    o_ref[...] = logits + jax.nn.sigmoid(t) * scl + sft


def _pack_head_vectors(n_cls, p_out, direction, width=HEAD_OUT_W):
    """[4, width] packing vectors: sel0/sel1 (ref x/y tiling), scale, shift."""
    col = jnp.arange(width)
    rel = col - n_cls
    coord = (col >= n_cls) & (col < n_cls + p_out)
    sel0 = (coord & (rel % 2 == 0)).astype(jnp.float32)
    sel1 = (coord & (rel % 2 == 1)).astype(jnp.float32)
    if direction:
        is_dir = coord & (rel >= 2)
        scale = jnp.where(is_dir, 2.0, jnp.where(coord, 1.0, 0.0))
        shift = jnp.where(is_dir, -1.0, 0.0)
    else:
        scale = coord.astype(jnp.float32)
        shift = jnp.zeros((width,), jnp.float32)
    return jnp.stack([sel0, sel1, scale, shift], axis=0)


def _pad_curve_mlp(ws, bs, n_cls, hidden_pad, n_layers_pad, width=HEAD_OUT_W):
    """Embed the 3-layer curve MLP into `n_layers_pad` layers of hidden width `hidden_pad`.
    Middle layers are exact identities (intermediates are post-ReLU >= 0, so ReLU(I x) = x).
    Only the final layer is padded to the 128-wide packed output slab."""
    D = ws[0].shape[0]
    dh = ws[0].shape[1]
    out_dim = ws[-1].shape[1]
    pws, pbs = [], []
    pws.append(jnp.zeros((D, hidden_pad), jnp.float32).at[:, :dh].set(ws[0]))
    pbs.append(jnp.zeros((hidden_pad,), jnp.float32).at[:dh].set(bs[0]))
    pws.append(jnp.zeros((hidden_pad, hidden_pad), jnp.float32).at[:dh, :dh].set(ws[1]))
    pbs.append(jnp.zeros((hidden_pad,), jnp.float32).at[:dh].set(bs[1]))
    for _ in range(n_layers_pad - 3):
        pws.append(jnp.eye(hidden_pad, dtype=jnp.float32))
        pbs.append(jnp.zeros((hidden_pad,), jnp.float32))
    pws.append(jnp.zeros((hidden_pad, width), jnp.float32)
               .at[:dh, n_cls:n_cls + out_dim].set(ws[2]))
    pbs.append(jnp.zeros((width,), jnp.float32).at[n_cls:n_cls + out_dim].set(bs[2]))
    return pws, pbs


def _pad_kpt_mlp(ws, bs, n_cls, width=HEAD_OUT_W):
    """Keypoint MLP: inner layers stay at their true width; final layer packed to `width`."""
    pws = [w.astype(jnp.float32) for w in ws[:-1]]
    pbs = [b.astype(jnp.float32) for b in bs[:-1]]
    hid = ws[-1].shape[0]
    out_dim = ws[-1].shape[1]
    pws.append(jnp.zeros((hid, width), jnp.float32).at[:, n_cls:n_cls + out_dim].set(ws[-1]))
    pbs.append(jnp.zeros((width,), jnp.float32).at[n_cls:n_cls + out_dim].set(bs[-1]))
    return pws, pbs


def _stack_xattn(a, b):
    wq = jnp.stack([a["wq"], b["wq"]])
    bq = jnp.stack([a["bq"].reshape(1, -1), b["bq"].reshape(1, -1)])
    wkv = jnp.stack([jnp.concatenate([a["wk"], a["wv"]], axis=1),
                     jnp.concatenate([b["wk"], b["wv"]], axis=1)])
    bkv = jnp.stack([jnp.concatenate([a["bk"], a["bv"]]).reshape(1, -1),
                     jnp.concatenate([b["bk"], b["bv"]]).reshape(1, -1)])
    wo = jnp.stack([a["wo"], b["wo"]])
    bo = jnp.stack([a["bo"].reshape(1, -1), b["bo"].reshape(1, -1)])
    return wq, bq, wkv, bkv, wo, bo


def fused_cross_attn_heads(p, hs, init_reference, inter_references):
    """Both CrossAttention blocks + both prediction heads (all decoder levels) in ONE
    pallas_call with grid=(2,) [problem 0: curves, problem 1: keypoints]."""
    L, B, _, D = hs.shape
    NP = OUT_PTS
    NQ = NUM_QUERIES
    NQP = NQ                      # common padded query / context count per (l, b)
    LB = L * B
    M = LB * NQP
    HN = NUM_HEADS * LB * NQP
    hd = D // NUM_HEADS
    scale = float(hd ** -0.5)
    W = HEAD_OUT_W

    pts_hs = hs[:, :, :NP]                                   # [L,B,4,D]
    hs_c = hs[:, :, NP:]                                     # [L,B,8,D]
    init_k, init_c = init_reference[:, :NP], init_reference[:, NP:]
    inter_k, inter_c = inter_references[:, :, :NP], inter_references[:, :, NP:]

    pts_pad = jnp.pad(pts_hs, ((0, 0), (0, 0), (0, NQP - NP), (0, 0)))

    x_stack = jnp.stack([hs_c.reshape(M, D), pts_pad.reshape(M, D)])       # [2, M, D]
    ctx_stack = jnp.stack([pts_pad.reshape(M, D), hs_c.reshape(M, D)])     # [2, M, D]

    # reference used at level l: init_reference (l == 0) else inter_references[l - 1]
    ref_c = jnp.concatenate([init_c[None], inter_c[:L - 1]], axis=0)       # [L,B,8,2]
    ref_k = jnp.concatenate([init_k[None], inter_k[:L - 1]], axis=0)       # [L,B,4,2]
    ref_k = jnp.pad(ref_k, ((0, 0), (0, 0), (0, NQP - NP), (0, 0)), constant_values=0.5)
    refs_stack = jnp.stack([ref_c.reshape(M, 2), ref_k.reshape(M, 2)])     # [2, M, 2]

    # validity masks: query row r may only attend to context lanes of its own (l, b) and
    # within the (unpadded) context length of the problem.
    r_idx = jnp.arange(M)[:, None]
    lane = jnp.arange(HN)[None, :]
    m_ctx = lane % (LB * NQP)
    same_lb = (m_ctx // NQP) == (r_idx // NQP)

    def vmask_for(nc_valid):
        return (same_lb & ((m_ctx % NQP) < nc_valid)).astype(jnp.float32)

    vmask = jnp.stack([vmask_for(NP), vmask_for(NQ)])                      # [2, M, HN]

    # head selector mask (shared, resident): hmask[lane, c] = (lane // (LB*Ncp) == c // hd)
    c_idx = jnp.arange(D)[None, :]
    hmask = ((lane.T // (LB * NQP)) == (c_idx // hd)).astype(jnp.float32)  # [HN, D]

    hp = jnp.stack([_pack_head_vectors(NUM_CLASSES, 2 * CPTS, False, W),
                    _pack_head_vectors(PTS_CLASS, 4, True, W)])            # [2, 4, W]

    wq, bq, wkv, bkv, wo, bo = _stack_xattn(p["ck_xattn"], p["kc_xattn"])

    cls_w = jnp.stack([
        jnp.zeros((D, W), jnp.float32).at[:, :NUM_CLASSES].set(p["curve_cls_w"]),
        jnp.zeros((D, W), jnp.float32).at[:, :PTS_CLASS].set(p["kpt_cls_w"])])
    cls_b = jnp.stack([
        jnp.zeros((1, W), jnp.float32).at[0, :NUM_CLASSES].set(p["curve_cls_b"]),
        jnp.zeros((1, W), jnp.float32).at[0, :PTS_CLASS].set(p["kpt_cls_b"])])

    kws, kbs = _pad_kpt_mlp(p["kpt_dir_mlp"]["ws"], p["kpt_dir_mlp"]["bs"], PTS_CLASS, W)
    n_mlp = len(kws)   # 6
    cws, cbs = _pad_curve_mlp(p["curve_pts_mlp"]["ws"], p["curve_pts_mlp"]["bs"],
                              NUM_CLASSES, hidden_pad=kws[1].shape[0], n_layers_pad=n_mlp,
                              width=W)

    def pspec(*shape):
        return pl.BlockSpec((None,) + shape, lambda pi: (pi,) + (0,) * len(shape))

    def sspec(*shape):
        return pl.BlockSpec(shape, lambda pi: (0,) * len(shape))

    mlp_args, mlp_specs = [], []
    for i in range(n_mlp):
        wst = jnp.stack([cws[i], kws[i]])
        bst = jnp.stack([cbs[i].reshape(1, -1), kbs[i].reshape(1, -1)])
        mlp_args += [wst, bst]
        mlp_specs += [pspec(*wst.shape[1:]), pspec(*bst.shape[1:])]

    in_specs = [
        pspec(M, D), pspec(M, D), pspec(M, 2), pspec(M, HN),
        sspec(HN, D),
        pspec(D, D), pspec(1, D),
        pspec(D, 2 * D), pspec(1, 2 * D),
        pspec(D, D), pspec(1, D),
        pspec(D, W), pspec(1, W),
    ] + mlp_specs + [pspec(4, W)]

    out = pl.pallas_call(
        functools.partial(_fused_xattn_head_kernel, num_heads=NUM_HEADS,
                          n_mlp_layers=n_mlp, scale=scale),
        out_shape=jax.ShapeDtypeStruct((2, M, W), jnp.float32),
        grid=(2,),
        in_specs=in_specs,
        out_specs=pspec(M, W),
        compiler_params=pltpu.CompilerParams(dimension_semantics=("parallel",)),
    )(x_stack, ctx_stack, refs_stack, vmask, hmask,
      wq, bq, wkv, bkv, wo, bo, cls_w, cls_b, *mlp_args, hp)

    out = out.reshape(2, L, B, NQP, W)
    curve_logits = out[0, ..., :NUM_CLASSES]
    curve_coords = out[0, ..., NUM_CLASSES:NUM_CLASSES + 2 * CPTS]
    kout = out[1, :, :, :NP]
    kpt_logits = kout[..., :PTS_CLASS]
    kpt_coords = kout[..., PTS_CLASS:PTS_CLASS + 4]

    def pack(logits, coords):
        res = {"pred_logits": logits[-1], "pred_points": coords[-1]}
        res["aux_outputs"] = [{"pred_logits": a, "pred_points": b}
                              for a, b in zip(logits[:-1], coords[:-1])]
        return res

    return {"curves": pack(curve_logits, curve_coords),
            "keypoints": pack(kpt_logits, kpt_coords)}


# --------------------------------------------------------------------------------------
# Parameter construction (deterministic, mirrors DeformableDETR.__init__)
# --------------------------------------------------------------------------------------
def make_params(key):
    keys = iter(jax.random.split(key, 64))

    def xavier(shape):
        fi, fo = shape
        lim = math.sqrt(6.0 / (fi + fo))
        return jax.random.uniform(next(keys), shape, jnp.float32, -lim, lim)

    def torch_linear(in_f, out_f):
        bound = 1.0 / math.sqrt(in_f)
        w = jax.random.uniform(next(keys), (in_f, out_f), jnp.float32, -bound, bound)
        b = jax.random.uniform(next(keys), (out_f,), jnp.float32, -bound, bound)
        return w, b

    D = HIDDEN_DIM
    bias_value = -math.log((1 - 0.01) / 0.01)
    p = {}

    # backbone stub projection (TODO(synk): real ResNet backbone not provided)
    p["bb_w"], p["bb_b"] = torch_linear(3, BACKBONE_CHANNELS)

    # input_proj[0]: Conv2d(C_back, D, k=1) xavier, bias 0; GroupNorm(32, D)
    p["proj_w"] = xavier((BACKBONE_CHANNELS, D))
    p["proj_b"] = jnp.zeros((D,), jnp.float32)
    p["gn_gamma"] = jnp.ones((D,), jnp.float32)
    p["gn_beta"] = jnp.zeros((D,), jnp.float32)

    # query_embed: nn.Embedding(num_queries + out_pts, 2*D), default N(0,1)
    p["query_embed"] = jax.random.normal(next(keys), (NUM_QUERIES + OUT_PTS, 2 * D), jnp.float32)

    # transformer stub params (TODO(synk): deformable transformer / MSDeformAttn not provided)
    p["ref_w"], p["ref_b"] = torch_linear(D, 2)
    p["dec_w"], p["dec_b"] = [], []
    for _ in range(NUM_DEC_LAYERS):
        w, b = torch_linear(D, D)
        p["dec_w"].append(w)
        p["dec_b"].append(b)

    # curve_class_embed: Linear(D, num_classes), bias = bias_value
    w, _ = torch_linear(D, NUM_CLASSES)
    p["curve_cls_w"] = w
    p["curve_cls_b"] = jnp.full((NUM_CLASSES,), bias_value, jnp.float32)

    # curve_points_embed: MLP(D, D, 2*cpts, 3); last layer weight=0, bias=[0,0,-2,-2,...]
    dims = [D, D, D, 2 * CPTS]
    ws, bs = [], []
    for i in range(3):
        w, b = torch_linear(dims[i], dims[i + 1])
        ws.append(w)
        bs.append(b)
    ws[-1] = jnp.zeros_like(ws[-1])
    bs[-1] = jnp.zeros((2 * CPTS,), jnp.float32).at[2:].set(-2.0)
    p["curve_pts_mlp"] = {"ws": ws, "bs": bs}

    # keypoint_class_embed: Linear(D, 3), bias = bias_value
    w, _ = torch_linear(D, PTS_CLASS)
    p["kpt_cls_w"] = w
    p["kpt_cls_b"] = jnp.full((PTS_CLASS,), bias_value, jnp.float32)

    # keypoint_point_direction_embed: MLP(D, 2D, 4, 6); last layer weight=0, bias=0
    dims = [D] + [2 * D] * 5 + [4]
    ws, bs = [], []
    for i in range(6):
        w, b = torch_linear(dims[i], dims[i + 1])
        ws.append(w)
        bs.append(b)
    ws[-1] = jnp.zeros_like(ws[-1])
    bs[-1] = jnp.zeros((4,), jnp.float32)
    p["kpt_dir_mlp"] = {"ws": ws, "bs": bs}

    # two cross-attention blocks (weights xavier, biases torch-default)
    def xattn_params():
        d = {}
        for name in ("q", "k", "v", "o"):
            d["w" + name] = xavier((D, D))
            bound = 1.0 / math.sqrt(D)
            d["b" + name] = jax.random.uniform(next(keys), (D,), jnp.float32, -bound, bound)
        return d

    p["ck_xattn"] = xattn_params()
    p["kc_xattn"] = xattn_params()
    return p


# --------------------------------------------------------------------------------------
# Forward
# --------------------------------------------------------------------------------------
def sine_pos_stub(h, w, d):
    # TODO(synk): real sine PositionEmbedding module not provided; deterministic stub.
    yy = jnp.arange(h, dtype=jnp.float32)[:, None, None]
    xx = jnp.arange(w, dtype=jnp.float32)[None, :, None]
    dim = jnp.arange(d, dtype=jnp.float32)[None, None, :]
    freq = 1.0 / (100.0 ** (dim / d))
    return jnp.sin(yy * freq) + jnp.cos(xx * freq)   # [h, w, d]


def deformable_detr_forward(params, images_nchw, mask):
    D = HIDDEN_DIM
    B = images_nchw.shape[0]
    # layout: convert NCHW -> NHWC for the kernel path
    images = jnp.transpose(images_nchw, (0, 2, 3, 1)).astype(jnp.float32)

    # ---- backbone stub (stride-8 avg pool + channel lift), plain jnp (tiny, XLA-fused) ----
    # TODO(synk): ResNet backbone is an external module; stubbed deterministically.
    H, W = images.shape[1], images.shape[2]
    feat = images.reshape(B, H // 8, 8, W // 8, 8, 3).mean(axis=(2, 4))        # [B,h,w,3]
    feat = jnp.tanh(jnp.dot(feat, params["bb_w"]) + params["bb_b"])            # [B,h,w,Cb]
    h, w = feat.shape[1], feat.shape[2]
    pos = jnp.broadcast_to(sine_pos_stub(h, w, D)[None], (B, h, w, D))

    # ---- input_proj: 1x1 conv + GroupNorm(32, D)  (Pallas kernel #1, one launch) ----------
    src = conv1x1_groupnorm(feat, params["proj_w"], params["proj_b"],
                            params["gn_gamma"], params["gn_beta"])             # [B,h,w,D]

    # ---- deformable transformer stub (plain jnp; external module) -------------------------
    # TODO(synk): deformable encoder/decoder (MSDeformAttn) is an external module; stub
    # reproduces its output signature (hs, init_reference, inter_references).
    src_flat = src.reshape(B, h * w, D)
    pos_flat = pos.reshape(B, h * w, D)
    qe = params["query_embed"]                   # [Nq+pts, 2D]
    query_pos, tgt = qe[:, :D], qe[:, D:]
    init_reference = jax.nn.sigmoid(jnp.dot(query_pos, params["ref_w"]) + params["ref_b"])
    init_reference = jnp.broadcast_to(init_reference[None], (B, NUM_QUERIES + OUT_PTS, 2))
    mem_pool = jnp.mean(src_flat + pos_flat, axis=1)                           # [B, D]
    hcur = (jnp.broadcast_to(tgt[None], (B, NUM_QUERIES + OUT_PTS, D))
            + jnp.broadcast_to(query_pos[None], (B, NUM_QUERIES + OUT_PTS, D))
            + mem_pool[:, None, :])
    hs_list = []
    for l in range(NUM_DEC_LAYERS):
        hcur = hcur + jax.nn.relu(jnp.dot(hcur, params["dec_w"][l]) + params["dec_b"][l])
        hs_list.append(hcur)
    hs = jnp.stack(hs_list)                                                    # [L,B,Nq+pts,D]
    # without box refinement the reference is unchanged across decoder layers
    inter_references = jnp.broadcast_to(init_reference[None],
                                        (NUM_DEC_LAYERS, B, NUM_QUERIES + OUT_PTS, 2))

    # ---- both cross attentions + both prediction heads (Pallas kernel #2, ONE launch) ------
    return fused_cross_attn_heads(params, hs, init_reference, inter_references)


# --------------------------------------------------------------------------------------
if __name__ == "__main__":
    key = jax.random.PRNGKey(0)
    k_param, k_img = jax.random.split(key)
    params = make_params(k_param)

    images = jax.random.normal(k_img, (BATCH, 3, IMG_H, IMG_W), jnp.float32)  # NCHW like torch
    mask = jnp.zeros((BATCH, IMG_H, IMG_W), jnp.bool_)                         # no padding

    fwd = jax.jit(functools.partial(deformable_detr_forward, params))
    results = fwd(images, mask)
    results = jax.block_until_ready(results)

    # sanity on shapes (no output printed besides the marker)
    assert results["curves"]["pred_logits"].shape == (BATCH, NUM_QUERIES, NUM_CLASSES)
    assert results["curves"]["pred_points"].shape == (BATCH, NUM_QUERIES, 2 * CPTS)
    assert results["keypoints"]["pred_logits"].shape == (BATCH, OUT_PTS, PTS_CLASS)
    assert results["keypoints"]["pred_points"].shape == (BATCH, OUT_PTS, 4)
    assert len(results["curves"]["aux_outputs"]) == NUM_DEC_LAYERS - 1
    assert len(results["keypoints"]["aux_outputs"]) == NUM_DEC_LAYERS - 1

    print("KERNEL_OK")
</pallas_src>

<mosaic_0001>
module attributes {stable_mosaic.version = 11 : i64} {
  func.func @_conv1x1_gn_kernel(%arg0: i32, %arg1: memref<32x64xf32, #tpu.memory_space<vmem>>, %arg2: memref<64x32xf32, #tpu.memory_space<vmem>>, %arg3: memref<1x32xf32, #tpu.memory_space<vmem>>, %arg4: memref<1x32xf32, #tpu.memory_space<vmem>>, %arg5: memref<1x32xf32, #tpu.memory_space<vmem>>, %arg6: memref<2x16x32xf32, #tpu.memory_space<vmem>>) attributes {dimension_semantics = [#tpu.dimension_semantics<arbitrary>], iteration_bounds = array<i64: 1>, scalar_prefetch = 0 : i64, scratch_operands = 0 : i64, tpu.core_type = #tpu.core_type<tc>, window_params = [{pipeline_mode = #tpu.pipeline_mode<synchronous>, transform_indices = @transform_0, window_bounds = array<i64: 32, 64>}, {pipeline_mode = #tpu.pipeline_mode<synchronous>, transform_indices = @transform_1, window_bounds = array<i64: 64, 32>}, {pipeline_mode = #tpu.pipeline_mode<synchronous>, transform_indices = @transform_2, window_bounds = array<i64: 1, 32>}, {pipeline_mode = #tpu.pipeline_mode<synchronous>, transform_indices = @transform_3, window_bounds = array<i64: 1, 32>}, {pipeline_mode = #tpu.pipeline_mode<synchronous>, transform_indices = @transform_4, window_bounds = array<i64: 1, 32>}, {pipeline_mode = #tpu.pipeline_mode<synchronous>, transform_indices = @transform_5, window_bounds = array<i64: 2, 16, 32>}]} {
    %c0 = arith.constant 0 : index
    %c0_0 = arith.constant 0 : index
    %0 = vector.load %arg1[%c0, %c0_0] : memref<32x64xf32, #tpu.memory_space<vmem>>, vector<32x64xf32>
    %c0_1 = arith.constant 0 : index
    %c0_2 = arith.constant 0 : index
    %1 = vector.load %arg2[%c0_1, %c0_2] : memref<64x32xf32, #tpu.memory_space<vmem>>, vector<64x32xf32>
    %cst = arith.constant dense<0.000000e+00> : vector<32x32xf32>
    %2 = tpu.matmul %0, %1, %cst {dimension_numbers = #tpu.dot_dimension_numbers<[1], [0], [0], [1], [0, 0, 1, 1], [], []>} : vector<32x64xf32>, vector<64x32xf32>, vector<32x32xf32> -> vector<32x32xf32>
    %c0_3 = arith.constant 0 : index
    %c0_4 = arith.constant 0 : index
    %3 = vector.load %arg3[%c0_3, %c0_4] : memref<1x32xf32, #tpu.memory_space<vmem>>, vector<1x32xf32>
    %4 = vector.broadcast %3 : vector<1x32xf32> to vector<32x32xf32>
    %5 = arith.addf %2, %4 : vector<32x32xf32>
    %c0_5 = arith.constant 0 : index
    %c0_6 = arith.constant 0 : index
    %6 = vector.load %arg4[%c0_5, %c0_6] : memref<1x32xf32, #tpu.memory_space<vmem>>, vector<1x32xf32>
    %c0_7 = arith.constant 0 : index
    %c0_8 = arith.constant 0 : index
    %7 = vector.load %arg5[%c0_7, %c0_8] : memref<1x32xf32, #tpu.memory_space<vmem>>, vector<1x32xf32>
    %8 = vector.extract_strided_slice %5 {offsets = [0, 0], sizes = [16, 32], strides = [1, 1]} : vector<32x32xf32> to vector<16x32xf32>
    %cst_9 = arith.constant dense<0.000000e+00> : vector<32xf32>
    %9 = vector.multi_reduction <add>, %8, %cst_9 [0] : vector<16x32xf32> to vector<32xf32>
    %10 = vector.shape_cast %9 : vector<32xf32> to vector<1x32xf32>
    %cst_10 = arith.constant 1.600000e+01 : f32
    %11 = vector.broadcast %cst_10 : f32 to vector<1x32xf32>
    %12 = arith.divf %10, %11 : vector<1x32xf32>
    %13 = vector.broadcast %12 : vector<1x32xf32> to vector<16x32xf32>
    %14 = arith.subf %8, %13 : vector<16x32xf32>
    %15 = arith.mulf %14, %14 : vector<16x32xf32>
    %cst_11 = arith.constant dense<0.000000e+00> : vector<32xf32>
    %16 = vector.multi_reduction <add>, %15, %cst_11 [0] : vector<16x32xf32> to vector<32xf32>
    %17 = vector.shape_cast %16 : vector<32xf32> to vector<1x32xf32>
    %cst_12 = arith.constant 1.600000e+01 : f32
    %18 = vector.broadcast %cst_12 : f32 to vector<1x32xf32>
    %19 = arith.divf %17, %18 : vector<1x32xf32>
    %20 = vector.broadcast %12 : vector<1x32xf32> to vector<16x32xf32>
    %21 = arith.subf %8, %20 : vector<16x32xf32>
    %cst_13 = arith.constant 9.99999974E-6 : f32
    %22 = vector.broadcast %cst_13 : f32 to vector<1x32xf32>
    %23 = arith.addf %19, %22 : vector<1x32xf32>
    %24 = math.rsqrt %23 : vector<1x32xf32>
    %25 = vector.broadcast %24 : vector<1x32xf32> to vector<16x32xf32>
    %26 = arith.mulf %21, %25 : vector<16x32xf32>
    %27 = vector.broadcast %6 : vector<1x32xf32> to vector<16x32xf32>
    %28 = arith.mulf %26, %27 : vector<16x32xf32>
    %29 = vector.broadcast %7 : vector<1x32xf32> to vector<16x32xf32>
    %30 = arith.addf %28, %29 : vector<16x32xf32>
    %c0_14 = arith.constant 0 : index
    %c0_15 = arith.constant 0 : index
    %c0_16 = arith.constant 0 : index
    %31 = vector.load %arg6[%c0_14, %c0_15, %c0_16] : memref<2x16x32xf32, #tpu.memory_space<vmem>>, vector<1x16x32xf32>
    %32 = vector.shape_cast %31 : vector<1x16x32xf32> to vector<16x32xf32>
    %33 = vector.shape_cast %30 : vector<16x32xf32> to vector<1x16x32xf32>
    tpu.vector_store %arg6[%c0_14, %c0_15, %c0_16], %33 {strides = array<i32>} : memref<2x16x32xf32, #tpu.memory_space<vmem>>, vector<1x16x32xf32>,
    %34 = vector.extract_strided_slice %5 {offsets = [16, 0], sizes = [16, 32], strides = [1, 1]} : vector<32x32xf32> to vector<16x32xf32>
    %cst_17 = arith.constant dense<0.000000e+00> : vector<32xf32>
    %35 = vector.multi_reduction <add>, %34, %cst_17 [0] : vector<16x32xf32> to vector<32xf32>
    %36 = vector.shape_cast %35 : vector<32xf32> to vector<1x32xf32>
    %cst_18 = arith.constant 1.600000e+01 : f32
    %37 = vector.broadcast %cst_18 : f32 to vector<1x32xf32>
    %38 = arith.divf %36, %37 : vector<1x32xf32>
    %39 = vector.broadcast %38 : vector<1x32xf32> to vector<16x32xf32>
    %40 = arith.subf %34, %39 : vector<16x32xf32>
    %41 = arith.mulf %40, %40 : vector<16x32xf32>
    %cst_19 = arith.constant dense<0.000000e+00> : vector<32xf32>
    %42 = vector.multi_reduction <add>, %41, %cst_19 [0] : vector<16x32xf32> to vector<32xf32>
    %43 = vector.shape_cast %42 : vector<32xf32> to vector<1x32xf32>
    %cst_20 = arith.constant 1.600000e+01 : f32
    %44 = vector.broadcast %cst_20 : f32 to vector<1x32xf32>
    %45 = arith.divf %43, %44 : vector<1x32xf32>
    %46 = vector.broadcast %38 : vector<1x32xf32> to vector<16x32xf32>
    %47 = arith.subf %34, %46 : vector<16x32xf32>
    %cst_21 = arith.constant 9.99999974E-6 : f32
    %48 = vector.broadcast %cst_21 : f32 to vector<1x32xf32>
    %49 = arith.addf %45, %48 : vector<1x32xf32>
    %50 = math.rsqrt %49 : vector<1x32xf32>
    %51 = vector.broadcast %50 : vector<1x32xf32> to vector<16x32xf32>
    %52 = arith.mulf %47, %51 : vector<16x32xf32>
    %53 = vector.broadcast %6 : vector<1x32xf32> to vector<16x32xf32>
    %54 = arith.mulf %52, %53 : vector<16x32xf32>
    %55 = vector.broadcast %7 : vector<1x32xf32> to vector<16x32xf32>
    %56 = arith.addf %54, %55 : vector<16x32xf32>
    %c1 = arith.constant 1 : index
    %c0_22 = arith.constant 0 : index
    %c0_23 = arith.constant 0 : index
    %57 = vector.load %arg6[%c1, %c0_22, %c0_23] : memref<2x16x32xf32, #tpu.memory_space<vmem>>, vector<1x16x32xf32>
    %58 = vector.shape_cast %57 : vector<1x16x32xf32> to vector<16x32xf32>
    %59 = vector.shape_cast %56 : vector<16x32xf32> to vector<1x16x32xf32>
    tpu.vector_store %arg6[%c1, %c0_22, %c0_23], %59 {strides = array<i32>} : memref<2x16x32xf32, #tpu.memory_space<vmem>>, vector<1x16x32xf32>,
    return
  }
  func.func @transform_0(%arg0: i32) -> (i32, i32) {
    %c0_i32 = arith.constant 0 : i32
    %c0_i32_0 = arith.constant 0 : i32
    %c0_i32_1 = arith.constant 0 : i32
    return %c0_i32, %c0_i32_0 : i32, i32
  }
  func.func @transform_1(%arg0: i32) -> (i32, i32) {
    %c0_i32 = arith.constant 0 : i32
    %c0_i32_0 = arith.constant 0 : i32
    %c0_i32_1 = arith.constant 0 : i32
    return %c0_i32, %c0_i32_0 : i32, i32
  }
  func.func @transform_2(%arg0: i32) -> (i32, i32) {
    %c0_i32 = arith.constant 0 : i32
    %c0_i32_0 = arith.constant 0 : i32
    %c0_i32_1 = arith.constant 0 : i32
    return %c0_i32, %c0_i32_0 : i32, i32
  }
  func.func @transform_3(%arg0: i32) -> (i32, i32) {
    %c0_i32 = arith.constant 0 : i32
    %c0_i32_0 = arith.constant 0 : i32
    %c0_i32_1 = arith.constant 0 : i32
    return %c0_i32, %c0_i32_0 : i32, i32
  }
  func.func @transform_4(%arg0: i32) -> (i32, i32) {
    %c0_i32 = arith.constant 0 : i32
    %c0_i32_0 = arith.constant 0 : i32
    %c0_i32_1 = arith.constant 0 : i32
    return %c0_i32, %c0_i32_0 : i32, i32
  }
  func.func @transform_5(%arg0: i32) -> (i32, i32, i32) {
    %c0_i32 = arith.constant 0 : i32
    %c0_i32_0 = arith.constant 0 : i32
    %c0_i32_1 = arith.constant 0 : i32
    %c0_i32_2 = arith.constant 0 : i32
    return %c0_i32, %c0_i32_0, %c0_i32_1 : i32, i32, i32
  }
}

module attributes {stable_mosaic.version = 11 : i64} {
  func.func @_fused_xattn_head_kernel(%arg0: i32, %arg1: memref<1x32x32xf32, #tpu.memory_space<vmem>>, %arg2: memref<1x32x32xf32, #tpu.memory_space<vmem>>, %arg3: memref<1x32x2xf32, #tpu.memory_space<vmem>>, %arg4: memref<1x32x256xf32, #tpu.memory_space<vmem>>, %arg5: memref<256x32xf32, #tpu.memory_space<vmem>>, %arg6: memref<1x32x32xf32, #tpu.memory_space<vmem>>, %arg7: memref<1x1x32xf32, #tpu.memory_space<vmem>>, %arg8: memref<1x32x64xf32, #tpu.memory_space<vmem>>, %arg9: memref<1x1x64xf32, #tpu.memory_space<vmem>>, %arg10: memref<1x32x32xf32, #tpu.memory_space<vmem>>, %arg11: memref<1x1x32xf32, #tpu.memory_space<vmem>>, %arg12: memref<1x32x128xf32, #tpu.memory_space<vmem>>, %arg13: memref<1x1x128xf32, #tpu.memory_space<vmem>>, %arg14: memref<1x32x64xf32, #tpu.memory_space<vmem>>, %arg15: memref<1x1x64xf32, #tpu.memory_space<vmem>>, %arg16: memref<1x64x64xf32, #tpu.memory_space<vmem>>, %arg17: memref<1x1x64xf32, #tpu.memory_space<vmem>>, %arg18: memref<1x64x64xf32, #tpu.memory_space<vmem>>, %arg19: memref<1x1x64xf32, #tpu.memory_space<vmem>>, %arg20: memref<1x64x64xf32, #tpu.memory_space<vmem>>, %arg21: memref<1x1x64xf32, #tpu.memory_space<vmem>>, %arg22: memref<1x64x64xf32, #tpu.memory_space<vmem>>, %arg23: memref<1x1x64xf32, #tpu.memory_space<vmem>>, %arg24: memref<1x64x128xf32, #tpu.memory_space<vmem>>, %arg25: memref<1x1x128xf32, #tpu.memory_space<vmem>>, %arg26: memref<1x4x128xf32, #tpu.memory_space<vmem>>, %arg27: memref<1x32x128xf32, #tpu.memory_space<vmem>>) attributes {dimension_semantics = [#tpu.dimension_semantics<parallel>], iteration_bounds = array<i64: 2>, scalar_prefetch = 0 : i64, scratch_operands = 0 : i64, tpu.core_type = #tpu.core_type<tc>, window_params = [{transform_indices = @transform_0, window_bounds = array<i64: 1, 32, 32>}, {transform_indices = @transform_1, window_bounds = array<i64: 1, 32, 32>}, {transform_indices = @transform_2, window_bounds = array<i64: 1, 32, 2>}, {transform_indices = @transform_3, window_bounds = array<i64: 1, 32, 256>}, {pipeline_mode = #tpu.pipeline_mode<synchronous>, transform_indices = @transform_4, window_bounds = array<i64: 256, 32>}, {transform_indices = @transform_5, window_bounds = array<i64: 1, 32, 32>}, {transform_indices = @transform_6, window_bounds = array<i64: 1, 1, 32>}, {transform_indices = @transform_7, window_bounds = array<i64: 1, 32, 64>}, {transform_indices = @transform_8, window_bounds = array<i64: 1, 1, 64>}, {transform_indices = @transform_9, window_bounds = array<i64: 1, 32, 32>}, {transform_indices = @transform_10, window_bounds = array<i64: 1, 1, 32>}, {transform_indices = @transform_11, window_bounds = array<i64: 1, 32, 128>}, {transform_indices = @transform_12, window_bounds = array<i64: 1, 1, 128>}, {transform_indices = @transform_13, window_bounds = array<i64: 1, 32, 64>}, {transform_indices = @transform_14, window_bounds = array<i64: 1, 1, 64>}, {transform_indices = @transform_15, window_bounds = array<i64: 1, 64, 64>}, {transform_indices = @transform_16, window_bounds = array<i64: 1, 1, 64>}, {transform_indices = @transform_17, window_bounds = array<i64: 1, 64, 64>}, {transform_indices = @transform_18, window_bounds = array<i64: 1, 1, 64>}, {transform_indices = @transform_19, window_bounds = array<i64: 1, 64, 64>}, {transform_indices = @transform_20, window_bounds = array<i64: 1, 1, 64>}, {transform_indices = @transform_21, window_bounds = array<i64: 1, 64, 64>}, {transform_indices = @transform_22, window_bounds = array<i64: 1, 1, 64>}, {transform_indices = @transform_23, window_bounds = array<i64: 1, 64, 128>}, {transform_indices = @transform_24, window_bounds = array<i64: 1, 1, 128>}, {transform_indices = @transform_25, window_bounds = array<i64: 1, 4, 128>}, {transform_indices = @transform_26, window_bounds = array<i64: 1, 32, 128>}]} {
    %c0 = arith.constant 0 : index
    %c0_0 = arith.constant 0 : index
    %c0_1 = arith.constant 0 : index
    %0 = vector.load %arg1[%c0, %c0_0, %c0_1] : memref<1x32x32xf32, #tpu.memory_space<vmem>>, vector<1x32x32xf32>
    %1 = vector.shape_cast %0 : vector<1x32x32xf32> to vector<32x32xf32>
    %c0_2 = arith.constant 0 : index
    %c0_3 = arith.constant 0 : index
    %c0_4 = arith.constant 0 : index
    %2 = vector.load %arg2[%c0_2, %c0_3, %c0_4] : memref<1x32x32xf32, #tpu.memory_space<vmem>>, vector<1x32x32xf32>
    %3 = vector.shape_cast %2 : vector<1x32x32xf32> to vector<32x32xf32>
    %c0_5 = arith.constant 0 : index
    %c0_6 = arith.constant 0 : index
    %c0_7 = arith.constant 0 : index
    %4 = vector.load %arg6[%c0_5, %c0_6, %c0_7] : memref<1x32x32xf32, #tpu.memory_space<vmem>>, vector<1x32x32xf32>
    %5 = vector.shape_cast %4 : vector<1x32x32xf32> to vector<32x32xf32>
    %cst = arith.constant dense<0.000000e+00> : vector<32x32xf32>
    %6 = tpu.matmul %1, %5, %cst {dimension_numbers = #tpu.dot_dimension_numbers<[1], [0], [0], [1], [0, 0, 1, 1], [], []>} : vector<32x32xf32>, vector<32x32xf32>, vector<32x32xf32> -> vector<32x32xf32>
    %c0_8 = arith.constant 0 : index
    %c0_9 = arith.constant 0 : index
    %c0_10 = arith.constant 0 : index
    %7 = vector.load %arg7[%c0_8, %c0_9, %c0_10] : memref<1x1x32xf32, #tpu.memory_space<vmem>>, vector<1x1x32xf32>
    %8 = vector.shape_cast %7 : vector<1x1x32xf32> to vector<1x32xf32>
    %9 = vector.broadcast %8 : vector<1x32xf32> to vector<32x32xf32>
    %10 = arith.addf %6, %9 : vector<32x32xf32>
    %c0_11 = arith.constant 0 : index
    %c0_12 = arith.constant 0 : index
    %c0_13 = arith.constant 0 : index
    %11 = vector.load %arg8[%c0_11, %c0_12, %c0_13] : memref<1x32x64xf32, #tpu.memory_space<vmem>>, vector<1x32x64xf32>
    %12 = vector.shape_cast %11 : vector<1x32x64xf32> to vector<32x64xf32>
    %cst_14 = arith.constant dense<0.000000e+00> : vector<32x64xf32>
    %13 = tpu.matmul %3, %12, %cst_14 {dimension_numbers = #tpu.dot_dimension_numbers<[1], [0], [0], [1], [0, 0, 1, 1], [], []>} : vector<32x32xf32>, vector<32x64xf32>, vector<32x64xf32> -> vector<32x64xf32>
    %c0_15 = arith.constant 0 : index
    %c0_16 = arith.constant 0 : index
    %c0_17 = arith.constant 0 : index
    %14 = vector.load %arg9[%c0_15, %c0_16, %c0_17] : memref<1x1x64xf32, #tpu.memory_space<vmem>>, vector<1x1x64xf32>
    %15 = vector.shape_cast %14 : vector<1x1x64xf32> to vector<1x64xf32>
    %16 = vector.broadcast %15 : vector<1x64xf32> to vector<32x64xf32>
    %17 = arith.addf %13, %16 : vector<32x64xf32>
    %18 = vector.extract_strided_slice %17 {offsets = [0, 0], sizes = [32, 32], strides = [1, 1]} : vector<32x64xf32> to vector<32x32xf32>
    %19 = vector.extract_strided_slice %17 {offsets = [0, 32], sizes = [32, 32], strides = [1, 1]} : vector<32x64xf32> to vector<32x32xf32>
    %c0_18 = arith.constant 0 : index
    %c0_19 = arith.constant 0 : index
    %20 = vector.load %arg5[%c0_18, %c0_19] : memref<256x32xf32, #tpu.memory_space<vmem>>, vector<256x32xf32>
    %21 = tpu.concatenate %18, %18, %18, %18, %18, %18, %18, %18 in 0 : vector<32x32xf32>, vector<32x32xf32>, vector<32x32xf32>, vector<32x32xf32>, vector<32x32xf32>, vector<32x32xf32>, vector<32x32xf32>, vector<32x32xf32> -> vector<256x32xf32>
    %22 = arith.mulf %21, %20 : vector<256x32xf32>
    %23 = tpu.concatenate %19, %19, %19, %19, %19, %19, %19, %19 in 0 : vector<32x32xf32>, vector<32x32xf32>, vector<32x32xf32>, vector<32x32xf32>, vector<32x32xf32>, vector<32x32xf32>, vector<32x32xf32>, vector<32x32xf32> -> vector<256x32xf32>
    %24 = arith.mulf %23, %20 : vector<256x32xf32>
    %cst_20 = arith.constant dense<0.000000e+00> : vector<32x256xf32>
    %25 = tpu.matmul %10, %22, %cst_20 {dimension_numbers = #tpu.dot_dimension_numbers<[1], [1], [0], [0], [0, 0, 1, 0], [], []>} : vector<32x32xf32>, vector<256x32xf32>, vector<32x256xf32> -> vector<32x256xf32>
    %cst_21 = arith.constant 5.000000e-01 : f32
    %26 = vector.broadcast %cst_21 : f32 to vector<32x256xf32>
    %27 = arith.mulf %25, %26 : vector<32x256xf32>
    %c0_22 = arith.constant 0 : index
    %c0_23 = arith.constant 0 : index
    %c0_24 = arith.constant 0 : index
    %28 = vector.load %arg4[%c0_22, %c0_23, %c0_24] : memref<1x32x256xf32, #tpu.memory_space<vmem>>, vector<1x32x256xf32>
    %29 = vector.shape_cast %28 : vector<1x32x256xf32> to vector<32x256xf32>
    %cst_25 = arith.constant 0.000000e+00 : f32
    %30 = vector.broadcast %cst_25 : f32 to vector<32x256xf32>
    %31 = arith.cmpf ogt, %29, %30 : vector<32x256xf32>
    %cst_26 = arith.constant -1.000000e+30 : f32
    %32 = vector.broadcast %cst_26 : f32 to vector<32x256xf32>
    %33 = arith.select %31, %27, %32 : vector<32x256xi1>, vector<32x256xf32>
    %cst_27 = arith.constant dense<0xFF800000> : vector<32xf32>
    %34 = vector.multi_reduction <maximumf>, %33, %cst_27 [1] : vector<32x256xf32> to vector<32xf32>
    %35 = vector.shape_cast %34 : vector<32xf32> to vector<32x1xf32>
    %36 = vector.broadcast %35 : vector<32x1xf32> to vector<32x256xf32>
    %37 = arith.subf %33, %36 : vector<32x256xf32>
    %38 = math.exp %37 : vector<32x256xf32>
    %cst_28 = arith.constant dense<0.000000e+00> : vector<32x32xf32>
    %39 = tpu.matmul %38, %24, %cst_28 {dimension_numbers = #tpu.dot_dimension_numbers<[1], [0], [0], [1], [0, 0, 1, 1], [], []>} : vector<32x256xf32>, vector<256x32xf32>, vector<32x32xf32> -> vector<32x32xf32>
    %cst_29 = arith.constant dense<0.000000e+00> : vector<32x32xf32>
    %40 = tpu.matmul %38, %20, %cst_29 {dimension_numbers = #tpu.dot_dimension_numbers<[1], [0], [0], [1], [0, 0, 1, 1], [], []>} : vector<32x256xf32>, vector<256x32xf32>, vector<32x32xf32> -> vector<32x32xf32>
    %41 = arith.divf %39, %40 : vector<32x32xf32>
    %c0_30 = arith.constant 0 : index
    %c0_31 = arith.constant 0 : index
    %c0_32 = arith.constant 0 : index
    %42 = vector.load %arg10[%c0_30, %c0_31, %c0_32] : memref<1x32x32xf32, #tpu.memory_space<vmem>>, vector<1x32x32xf32>
    %43 = vector.shape_cast %42 : vector<1x32x32xf32> to vector<32x32xf32>
    %cst_33 = arith.constant dense<0.000000e+00> : vector<32x32xf32>
    %44 = tpu.matmul %41, %43, %cst_33 {dimension_numbers = #tpu.dot_dimension_numbers<[1], [0], [0], [1], [0, 0, 1, 1], [], []>} : vector<32x32xf32>, vector<32x32xf32>, vector<32x32xf32> -> vector<32x32xf32>
    %c0_34 = arith.constant 0 : index
    %c0_35 = arith.constant 0 : index
    %c0_36 = arith.constant 0 : index
    %45 = vector.load %arg11[%c0_34, %c0_35, %c0_36] : memref<1x1x32xf32, #tpu.memory_space<vmem>>, vector<1x1x32xf32>
    %46 = vector.shape_cast %45 : vector<1x1x32xf32> to vector<1x32xf32>
    %47 = vector.broadcast %46 : vector<1x32xf32> to vector<32x32xf32>
    %48 = arith.addf %44, %47 : vector<32x32xf32>
    %49 = arith.addf %48, %1 : vector<32x32xf32>
    %c0_37 = arith.constant 0 : index
    %c0_38 = arith.constant 0 : index
    %c0_39 = arith.constant 0 : index
    %50 = vector.load %arg12[%c0_37, %c0_38, %c0_39] : memref<1x32x128xf32, #tpu.memory_space<vmem>>, vector<1x32x128xf32>
    %51 = vector.shape_cast %50 : vector<1x32x128xf32> to vector<32x128xf32>
    %cst_40 = arith.constant dense<0.000000e+00> : vector<32x128xf32>
    %52 = tpu.matmul %49, %51, %cst_40 {dimension_numbers = #tpu.dot_dimension_numbers<[1], [0], [0], [1], [0, 0, 1, 1], [], []>} : vector<32x32xf32>, vector<32x128xf32>, vector<32x128xf32> -> vector<32x128xf32>
    %c0_41 = arith.constant 0 : index
    %c0_42 = arith.constant 0 : index
    %c0_43 = arith.constant 0 : index
    %53 = vector.load %arg13[%c0_41, %c0_42, %c0_43] : memref<1x1x128xf32, #tpu.memory_space<vmem>>, vector<1x1x128xf32>
    %54 = vector.shape_cast %53 : vector<1x1x128xf32> to vector<1x128xf32>
    %55 = vector.broadcast %54 : vector<1x128xf32> to vector<32x128xf32>
    %56 = arith.addf %52, %55 : vector<32x128xf32>
    %c0_44 = arith.constant 0 : index
    %c0_45 = arith.constant 0 : index
    %c0_46 = arith.constant 0 : index
    %57 = vector.load %arg14[%c0_44, %c0_45, %c0_46] : memref<1x32x64xf32, #tpu.memory_space<vmem>>, vector<1x32x64xf32>
    %58 = vector.shape_cast %57 : vector<1x32x64xf32> to vector<32x64xf32>
    %cst_47 = arith.constant dense<0.000000e+00> : vector<32x64xf32>
    %59 = tpu.matmul %49, %58, %cst_47 {dimension_numbers = #tpu.dot_dimension_numbers<[1], [0], [0], [1], [0, 0, 1, 1], [], []>} : vector<32x32xf32>, vector<32x64xf32>, vector<32x64xf32> -> vector<32x64xf32>
    %c0_48 = arith.constant 0 : index
    %c0_49 = arith.constant 0 : index
    %c0_50 = arith.constant 0 : index
    %60 = vector.load %arg15[%c0_48, %c0_49, %c0_50] : memref<1x1x64xf32, #tpu.memory_space<vmem>>, vector<1x1x64xf32>
    %61 = vector.shape_cast %60 : vector<1x1x64xf32> to vector<1x64xf32>
    %62 = vector.broadcast %61 : vector<1x64xf32> to vector<32x64xf32>
    %63 = arith.addf %59, %62 : vector<32x64xf32>
    %cst_51 = arith.constant 0.000000e+00 : f32
    %64 = vector.broadcast %cst_51 : f32 to vector<32x64xf32>
    %65 = arith.maximumf %63, %64 : vector<32x64xf32>
    %c0_52 = arith.constant 0 : index
    %c0_53 = arith.constant 0 : index
    %c0_54 = arith.constant 0 : index
    %66 = vector.load %arg16[%c0_52, %c0_53, %c0_54] : memref<1x64x64xf32, #tpu.memory_space<vmem>>, vector<1x64x64xf32>
    %67 = vector.shape_cast %66 : vector<1x64x64xf32> to vector<64x64xf32>
    %cst_55 = arith.constant dense<0.000000e+00> : vector<32x64xf32>
    %68 = tpu.matmul %65, %67, %cst_55 {dimension_numbers = #tpu.dot_dimension_numbers<[1], [0], [0], [1], [0, 0, 1, 1], [], []>} : vector<32x64xf32>, vector<64x64xf32>, vector<32x64xf32> -> vector<32x64xf32>
    %c0_56 = arith.constant 0 : index
    %c0_57 = arith.constant 0 : index
    %c0_58 = arith.constant 0 : index
    %69 = vector.load %arg17[%c0_56, %c0_57, %c0_58] : memref<1x1x64xf32, #tpu.memory_space<vmem>>, vector<1x1x64xf32>
    %70 = vector.shape_cast %69 : vector<1x1x64xf32> to vector<1x64xf32>
    %71 = vector.broadcast %70 : vector<1x64xf32> to vector<32x64xf32>
    %72 = arith.addf %68, %71 : vector<32x64xf32>
    %cst_59 = arith.constant 0.000000e+00 : f32
    %73 = vector.broadcast %cst_59 : f32 to vector<32x64xf32>
    %74 = arith.maximumf %72, %73 : vector<32x64xf32>
    %c0_60 = arith.constant 0 : index
    %c0_61 = arith.constant 0 : index
    %c0_62 = arith.constant 0 : index
    %75 = vector.load %arg18[%c0_60, %c0_61, %c0_62] : memref<1x64x64xf32, #tpu.memory_space<vmem>>, vector<1x64x64xf32>
    %76 = vector.shape_cast %75 : vector<1x64x64xf32> to vector<64x64xf32>
    %cst_63 = arith.constant dense<0.000000e+00> : vector<32x64xf32>
    %77 = tpu.matmul %74, %76, %cst_63 {dimension_numbers = #tpu.dot_dimension_numbers<[1], [0], [0], [1], [0, 0, 1, 1], [], []>} : vector<32x64xf32>, vector<64x64xf32>, vector<32x64xf32> -> vector<32x64xf32>
    %c0_64 = arith.constant 0 : index
    %c0_65 = arith.constant 0 : index
    %c0_66 = arith.constant 0 : index
    %78 = vector.load %arg19[%c0_64, %c0_65, %c0_66] : memref<1x1x64xf32, #tpu.memory_space<vmem>>, vector<1x1x64xf32>
    %79 = vector.shape_cast %78 : vector<1x1x64xf32> to vector<1x64xf32>
    %80 = vector.broadcast %79 : vector<1x64xf32> to vector<32x64xf32>
    %81 = arith.addf %77, %80 : vector<32x64xf32>
    %cst_67 = arith.constant 0.000000e+00 : f32
    %82 = vector.broadcast %cst_67 : f32 to vector<32x64xf32>
    %83 = arith.maximumf %81, %82 : vector<32x64xf32>
    %c0_68 = arith.constant 0 : index
    %c0_69 = arith.constant 0 : index
    %c0_70 = arith.constant 0 : index
    %84 = vector.load %arg20[%c0_68, %c0_69, %c0_70] : memref<1x64x64xf32, #tpu.memory_space<vmem>>, vector<1x64x64xf32>
    %85 = vector.shape_cast %84 : vector<1x64x64xf32> to vector<64x64xf32>
    %cst_71 = arith.constant dense<0.000000e+00> : vector<32x64xf32>
    %86 = tpu.matmul %83, %85, %cst_71 {dimension_numbers = #tpu.dot_dimension_numbers<[1], [0], [0], [1], [0, 0, 1, 1], [], []>} : vector<32x64xf32>, vector<64x64xf32>, vector<32x64xf32> -> vector<32x64xf32>
    %c0_72 = arith.constant 0 : index
    %c0_73 = arith.constant 0 : index
    %c0_74 = arith.constant 0 : index
    %87 = vector.load %arg21[%c0_72, %c0_73, %c0_74] : memref<1x1x64xf32, #tpu.memory_space<vmem>>, vector<1x1x64xf32>
    %88 = vector.shape_cast %87 : vector<1x1x64xf32> to vector<1x64xf32>
    %89 = vector.broadcast %88 : vector<1x64xf32> to vector<32x64xf32>
    %90 = arith.addf %86, %89 : vector<32x64xf32>
    %cst_75 = arith.constant 0.000000e+00 : f32
    %91 = vector.broadcast %cst_75 : f32 to vector<32x64xf32>
    %92 = arith.maximumf %90, %91 : vector<32x64xf32>
    %c0_76 = arith.constant 0 : index
    %c0_77 = arith.constant 0 : index
    %c0_78 = arith.constant 0 : index
    %93 = vector.load %arg22[%c0_76, %c0_77, %c0_78] : memref<1x64x64xf32, #tpu.memory_space<vmem>>, vector<1x64x64xf32>
    %94 = vector.shape_cast %93 : vector<1x64x64xf32> to vector<64x64xf32>
    %cst_79 = arith.constant dense<0.000000e+00> : vector<32x64xf32>
    %95 = tpu.matmul %92, %94, %cst_79 {dimension_numbers = #tpu.dot_dimension_numbers<[1], [0], [0], [1], [0, 0, 1, 1], [], []>} : vector<32x64xf32>, vector<64x64xf32>, vector<32x64xf32> -> vector<32x64xf32>
    %c0_80 = arith.constant 0 : index
    %c0_81 = arith.constant 0 : index
    %c0_82 = arith.constant 0 : index
    %96 = vector.load %arg23[%c0_80, %c0_81, %c0_82] : memref<1x1x64xf32, #tpu.memory_space<vmem>>, vector<1x1x64xf32>
    %97 = vector.shape_cast %96 : vector<1x1x64xf32> to vector<1x64xf32>
    %98 = vector.broadcast %97 : vector<1x64xf32> to vector<32x64xf32>
    %99 = arith.addf %95, %98 : vector<32x64xf32>
    %cst_83 = arith.constant 0.000000e+00 : f32
    %100 = vector.broadcast %cst_83 : f32 to vector<32x64xf32>
    %101 = arith.maximumf %99, %100 : vector<32x64xf32>
    %c0_84 = arith.constant 0 : index
    %c0_85 = arith.constant 0 : index
    %c0_86 = arith.constant 0 : index
    %102 = vector.load %arg24[%c0_84, %c0_85, %c0_86] : memref<1x64x128xf32, #tpu.memory_space<vmem>>, vector<1x64x128xf32>
    %103 = vector.shape_cast %102 : vector<1x64x128xf32> to vector<64x128xf32>
    %cst_87 = arith.constant dense<0.000000e+00> : vector<32x128xf32>
    %104 = tpu.matmul %101, %103, %cst_87 {dimension_numbers = #tpu.dot_dimension_numbers<[1], [0], [0], [1], [0, 0, 1, 1], [], []>} : vector<32x64xf32>, vector<64x128xf32>, vector<32x128xf32> -> vector<32x128xf32>
    %c0_88 = arith.constant 0 : index
    %c0_89 = arith.constant 0 : index
    %c0_90 = arith.constant 0 : index
    %105 = vector.load %arg25[%c0_88, %c0_89, %c0_90] : memref<1x1x128xf32, #tpu.memory_space<vmem>>, vector<1x1x128xf32>
    %106 = vector.shape_cast %105 : vector<1x1x128xf32> to vector<1x128xf32>
    %107 = vector.broadcast %106 : vector<1x128xf32> to vector<32x128xf32>
    %108 = arith.addf %104, %107 : vector<32x128xf32>
    %c0_91 = arith.constant 0 : index
    %c0_92 = arith.constant 0 : index
    %c0_93 = arith.constant 0 : index
    %109 = vector.load %arg3[%c0_91, %c0_92, %c0_93] : memref<1x32x2xf32, #tpu.memory_space<vmem>>, vector<1x32x2xf32>
    %110 = vector.shape_cast %109 : vector<1x32x2xf32> to vector<32x2xf32>
    %cst_94 = arith.constant 0.000000e+00 : f32
    %cst_95 = arith.constant 1.000000e+00 : f32
    %111 = vector.broadcast %cst_94 : f32 to vector<32x2xf32>
    %112 = arith.maximumf %111, %110 : vector<32x2xf32>
    %113 = vector.broadcast %cst_95 : f32 to vector<32x2xf32>
    %114 = arith.minimumf %113, %112 : vector<32x2xf32>
    %cst_96 = arith.constant 9.99999974E-6 : f32
    %115 = vector.broadcast %cst_96 : f32 to vector<32x2xf32>
    %116 = arith.maximumf %114, %115 : vector<32x2xf32>
    %cst_97 = arith.constant 1.000000e+00 : f32
    %117 = vector.broadcast %cst_97 : f32 to vector<32x2xf32>
    %118 = arith.subf %117, %114 : vector<32x2xf32>
    %cst_98 = arith.constant 9.99999974E-6 : f32
    %119 = vector.broadcast %cst_98 : f32 to vector<32x2xf32>
    %120 = arith.maximumf %118, %119 : vector<32x2xf32>
    %121 = arith.divf %116, %120 : vector<32x2xf32>
    %122 = math.log %121 : vector<32x2xf32>
    %123 = vector.extract_strided_slice %122 {offsets = [0, 0], sizes = [32, 1], strides = [1, 1]} : vector<32x2xf32> to vector<32x1xf32>
    %124 = vector.extract_strided_slice %122 {offsets = [0, 1], sizes = [32, 1], strides = [1, 1]} : vector<32x2xf32> to vector<32x1xf32>
    %c0_99 = arith.constant 0 : index
    %c0_100 = arith.constant 0 : index
    %c0_101 = arith.constant 0 : index
    %125 = vector.load %arg26[%c0_99, %c0_100, %c0_101] : memref<1x4x128xf32, #tpu.memory_space<vmem>>, vector<1x4x128xf32>
    %126 = vector.shape_cast %125 : vector<1x4x128xf32> to vector<4x128xf32>
    %127 = vector.extract_strided_slice %126 {offsets = [0, 0], sizes = [1, 128], strides = [1, 1]} : vector<4x128xf32> to vector<1x128xf32>
    %128 = vector.extract_strided_slice %126 {offsets = [1, 0], sizes = [1, 128], strides = [1, 1]} : vector<4x128xf32> to vector<1x128xf32>
    %129 = vector.extract_strided_slice %126 {offsets = [2, 0], sizes = [1, 128], strides = [1, 1]} : vector<4x128xf32> to vector<1x128xf32>
    %130 = vector.extract_strided_slice %126 {offsets = [3, 0], sizes = [1, 128], strides = [1, 1]} : vector<4x128xf32> to vector<1x128xf32>
    %131 = vector.broadcast %127 : vector<1x128xf32> to vector<32x128xf32>
    %132 = vector.broadcast %123 : vector<32x1xf32> to vector<32x128xf32>
    %133 = arith.mulf %131, %132 : vector<32x128xf32>
    %134 = arith.addf %108, %133 : vector<32x128xf32>
    %135 = vector.broadcast %128 : vector<1x128xf32> to vector<32x128xf32>
    %136 = vector.broadcast %124 : vector<32x1xf32> to vector<32x128xf32>
    %137 = arith.mulf %135, %136 : vector<32x128xf32>
    %138 = arith.addf %134, %137 : vector<32x128xf32>
    %139 = arith.negf %138 : vector<32x128xf32>
    %140 = math.exp %139 : vector<32x128xf32>
    %cst_102 = arith.constant 1.000000e+00 : f32
    %141 = vector.broadcast %cst_102 : f32 to vector<32x128xf32>
    %142 = arith.addf %141, %140 : vector<32x128xf32>
    %143 = arith.divf %141, %142 : vector<32x128xf32>
    %144 = vector.broadcast %129 : vector<1x128xf32> to vector<32x128xf32>
    %145 = arith.mulf %143, %144 : vector<32x128xf32>
    %146 = arith.addf %56, %145 : vector<32x128xf32>
    %147 = vector.broadcast %130 : vector<1x128xf32> to vector<32x128xf32>
    %148 = arith.addf %146, %147 : vector<32x128xf32>
    %c0_103 = arith.constant 0 : index
    %c0_104 = arith.constant 0 : index
    %c0_105 = arith.constant 0 : index
    %149 = vector.load %arg27[%c0_103, %c0_104, %c0_105] : memref<1x32x128xf32, #tpu.memory_space<vmem>>, vector<1x32x128xf32>
    %150 = vector.shape_cast %149 : vector<1x32x128xf32> to vector<32x128xf32>
    %151 = vector.shape_cast %148 : vector<32x128xf32> to vector<1x32x128xf32>
    tpu.vector_store %arg27[%c0_103, %c0_104, %c0_105], %151 {strides = array<i32>} : memref<1x32x128xf32, #tpu.memory_space<vmem>>, vector<1x32x128xf32>,
    return
  }
  func.func @transform_0(%arg0: i32) -> (i32, i32, i32) {
    %c0_i32 = arith.constant 0 : i32
    %c0_i32_0 = arith.constant 0 : i32
    %c0_i32_1 = arith.constant 0 : i32
    return %arg0, %c0_i32, %c0_i32_0 : i32, i32, i32
  }
  func.func @transform_1(%arg0: i32) -> (i32, i32, i32) {
    %c0_i32 = arith.constant 0 : i32
    %c0_i32_0 = arith.constant 0 : i32
    %c0_i32_1 = arith.constant 0 : i32
    return %arg0, %c0_i32, %c0_i32_0 : i32, i32, i32
  }
  func.func @transform_2(%arg0: i32) -> (i32, i32, i32) {
    %c0_i32 = arith.constant 0 : i32
    %c0_i32_0 = arith.constant 0 : i32
    %c0_i32_1 = arith.constant 0 : i32
    return %arg0, %c0_i32, %c0_i32_0 : i32, i32, i32
  }
  func.func @transform_3(%arg0: i32) -> (i32, i32, i32) {
    %c0_i32 = arith.constant 0 : i32
    %c0_i32_0 = arith.constant 0 : i32
    %c0_i32_1 = arith.constant 0 : i32
    return %arg0, %c0_i32, %c0_i32_0 : i32, i32, i32
  }
  func.func @transform_4(%arg0: i32) -> (i32, i32) {
    %c0_i32 = arith.constant 0 : i32
    %c0_i32_0 = arith.constant 0 : i32
    %c0_i32_1 = arith.constant 0 : i32
    return %c0_i32, %c0_i32_0 : i32, i32
  }
  func.func @transform_5(%arg0: i32) -> (i32, i32, i32) {
    %c0_i32 = arith.constant 0 : i32
    %c0_i32_0 = arith.constant 0 : i32
    %c0_i32_1 = arith.constant 0 : i32
    return %arg0, %c0_i32, %c0_i32_0 : i32, i32, i32
  }
  func.func @transform_6(%arg0: i32) -> (i32, i32, i32) {
    %c0_i32 = arith.constant 0 : i32
    %c0_i32_0 = arith.constant 0 : i32
    %c0_i32_1 = arith.constant 0 : i32
    return %arg0, %c0_i32, %c0_i32_0 : i32, i32, i32
  }
  func.func @transform_7(%arg0: i32) -> (i32, i32, i32) {
    %c0_i32 = arith.constant 0 : i32
    %c0_i32_0 = arith.constant 0 : i32
    %c0_i32_1 = arith.constant 0 : i32
    return %arg0, %c0_i32, %c0_i32_0 : i32, i32, i32
  }
  func.func @transform_8(%arg0: i32) -> (i32, i32, i32) {
    %c0_i32 = arith.constant 0 : i32
    %c0_i32_0 = arith.constant 0 : i32
    %c0_i32_1 = arith.constant 0 : i32
    return %arg0, %c0_i32, %c0_i32_0 : i32, i32, i32
  }
  func.func @transform_9(%arg0: i32) -> (i32, i32, i32) {
    %c0_i32 = arith.constant 0 : i32
    %c0_i32_0 = arith.constant 0 : i32
    %c0_i32_1 = arith.constant 0 : i32
    return %arg0, %c0_i32, %c0_i32_0 : i32, i32, i32
  }
  func.func @transform_10(%arg0: i32) -> (i32, i32, i32) {
    %c0_i32 = arith.constant 0 : i32
    %c0_i32_0 = arith.constant 0 : i32
    %c0_i32_1 = arith.constant 0 : i32
    return %arg0, %c0_i32, %c0_i32_0 : i32, i32, i32
  }
  func.func @transform_11(%arg0: i32) -> (i32, i32, i32) {
    %c0_i32 = arith.constant 0 : i32
    %c0_i32_0 = arith.constant 0 : i32
    %c0_i32_1 = arith.constant 0 : i32
    return %arg0, %c0_i32, %c0_i32_0 : i32, i32, i32
  }
  func.func @transform_12(%arg0: i32) -> (i32, i32, i32) {
    %c0_i32 = arith.constant 0 : i32
    %c0_i32_0 = arith.constant 0 : i32
    %c0_i32_1 = arith.constant 0 : i32
    return %arg0, %c0_i32, %c0_i32_0 : i32, i32, i32
  }
  func.func @transform_13(%arg0: i32) -> (i32, i32, i32) {
    %c0_i32 = arith.constant 0 : i32
    %c0_i32_0 = arith.constant 0 : i32
    %c0_i32_1 = arith.constant 0 : i32
    return %arg0, %c0_i32, %c0_i32_0 : i32, i32, i32
  }
  func.func @transform_14(%arg0: i32) -> (i32, i32, i32) {
    %c0_i32 = arith.constant 0 : i32
    %c0_i32_0 = arith.constant 0 : i32
    %c0_i32_1 = arith.constant 0 : i32
    return %arg0, %c0_i32, %c0_i32_0 : i32, i32, i32
  }
  func.func @transform_15(%arg0: i32) -> (i32, i32, i32) {
    %c0_i32 = arith.constant 0 : i32
    %c0_i32_0 = arith.constant 0 : i32
    %c0_i32_1 = arith.constant 0 : i32
    return %arg0, %c0_i32, %c0_i32_0 : i32, i32, i32
  }
  func.func @transform_16(%arg0: i32) -> (i32, i32, i32) {
    %c0_i32 = arith.constant 0 : i32
    %c0_i32_0 = arith.constant 0 : i32
    %c0_i32_1 = arith.constant 0 : i32
    return %arg0, %c0_i32, %c0_i32_0 : i32, i32, i32
  }
  func.func @transform_17(%arg0: i32) -> (i32, i32, i32) {
    %c0_i32 = arith.constant 0 : i32
    %c0_i32_0 = arith.constant 0 : i32
    %c0_i32_1 = arith.constant 0 : i32
    return %arg0, %c0_i32, %c0_i32_0 : i32, i32, i32
  }
  func.func @transform_18(%arg0: i32) -> (i32, i32, i32) {
    %c0_i32 = arith.constant 0 : i32
    %c0_i32_0 = arith.constant 0 : i32
    %c0_i32_1 = arith.constant 0 : i32
    return %arg0, %c0_i32, %c0_i32_0 : i32, i32, i32
  }
  func.func @transform_19(%arg0: i32) -> (i32, i32, i32) {
    %c0_i32 = arith.constant 0 : i32
    %c0_i32_0 = arith.constant 0 : i32
    %c0_i32_1 = arith.constant 0 : i32
    return %arg0, %c0_i32, %c0_i32_0 : i32, i32, i32
  }
  func.func @transform_20(%arg0: i32) -> (i32, i32, i32) {
    %c0_i32 = arith.constant 0 : i32
    %c0_i32_0 = arith.constant 0 : i32
    %c0_i32_1 = arith.constant 0 : i32
    return %arg0, %c0_i32, %c0_i32_0 : i32, i32, i32
  }
  func.func @transform_21(%arg0: i32) -> (i32, i32, i32) {
    %c0_i32 = arith.constant 0 : i32
    %c0_i32_0 = arith.constant 0 : i32
    %c0_i32_1 = arith.constant 0 : i32
    return %arg0, %c0_i32, %c0_i32_0 : i32, i32, i32
  }
  func.func @transform_22(%arg0: i32) -> (i32, i32, i32) {
    %c0_i32 = arith.constant 0 : i32
    %c0_i32_0 = arith.constant 0 : i32
    %c0_i32_1 = arith.constant 0 : i32
    return %arg0, %c0_i32, %c0_i32_0 : i32, i32, i32
  }
  func.func @transform_23(%arg0: i32) -> (i32, i32, i32) {
    %c0_i32 = arith.constant 0 : i32
    %c0_i32_0 = arith.constant 0 : i32
    %c0_i32_1 = arith.constant 0 : i32
    return %arg0, %c0_i32, %c0_i32_0 : i32, i32, i32
  }
  func.func @transform_24(%arg0: i32) -> (i32, i32, i32) {
    %c0_i32 = arith.constant 0 : i32
    %c0_i32_0 = arith.constant 0 : i32
    %c0_i32_1 = arith.constant 0 : i32
    return %arg0, %c0_i32, %c0_i32_0 : i32, i32, i32
  }
  func.func @transform_25(%arg0: i32) -> (i32, i32, i32) {
    %c0_i32 = arith.constant 0 : i32
    %c0_i32_0 = arith.constant 0 : i32
    %c0_i32_1 = arith.constant 0 : i32
    return %arg0, %c0_i32, %c0_i32_0 : i32, i32, i32
  }
  func.func @transform_26(%arg0: i32) -> (i32, i32, i32) {
    %c0_i32 = arith.constant 0 : i32
    %c0_i32_0 = arith.constant 0 : i32
    %c0_i32_1 = arith.constant 0 : i32
    return %arg0, %c0_i32, %c0_i32_0 : i32, i32, i32
  }
}

</mosaic_0001>

<bundles_post_ra>
// kernel: deformable_detr_forward.2
= control target key start
LH: loop header
LB: loop body
LE: loop exit
PB: predicated region body
PF: predicated region fallthrough
CT: control target
= control target key end

     0   :  { %vm36_vm0 = vcmask 523264   ;;  %v225_v12 = vmov 16.0   ;;  %vm80_vm1 = vcmask 261120   ;;  %s325_s1 = inlined_call_operand.vmem [shape: f32[64,32], index: 1, kind: input, shape index: {}]   ;;  %s326_s2 = inlined_call_operand.vmem [shape: f32[1,32], index: 2, kind: input, shape index: {}, may-alias: {2,4}]   ;;  %s327_s0 = inlined_call_operand.vmem [shape: f32[32,64], index: 0, kind: input, shape index: {}]   ;;  %s328_s3 = inlined_call_operand.vmem [shape: f32[1,32], index: 3, kind: input, shape index: {}]   ;;  %s329_s4 = inlined_call_operand.vmem [shape: f32[1,32], index: 4, kind: input, shape index: {}, may-alias: {2,4}]   ;;  %s330_s5 = inlined_call_operand.vmem [shape: f32[2,16,32], index: 5, kind: output, shape index: {}]  }
   0x1   :  { %v31_v0 = vld [vmem:[%s325_s1 + $0x38] sm:$0xff]  ;;  %v30_v1 = vld [vmem:[%s325_s1 + $0x30] sm:$0xff]  ;;  %v29_v2 = vld [vmem:[%s325_s1 + $0x28] sm:$0xff]  ;;  %219 = vrcp.f32 %v225_v12 }
   0x2   :  { %57 = vmatpush.msra.mxu0 %v31_v0  ;;  %191 = vmatpush.msra.mxu1 %v31_v0  ;;  %v28_v3 = vld [vmem:[%s325_s1 + $0x20] sm:$0xff]  ;;  %v27_v4 = vld [vmem:[%s325_s1 + $0x18] sm:$0xff]  ;;  %v26_v5 = vld [vmem:[%s325_s1 + $0x10] sm:$0xff] }
   0x3   :  { %192 = vmatpush.msra.mxu2 %v31_v0  ;;  %193 = vmatpush.msra.mxu3 %v31_v0  ;;  %v25_v6 = vld [vmem:[%s325_s1 + $0x8] sm:$0xff]  ;;  %v24_v7 = vld [vmem:[%s325_s1] sm:$0xff]  ;;  %v22_v10 = vld [vmem:[%s327_s0 + $0x10] sm:$0xff] }
   0x4   :  { %58 = vmatpush.msra.mxu0 %v30_v1  ;;  %194 = vmatpush.msra.mxu1 %v30_v1  ;;  %v20_v8 = vld [vmem:[%s327_s0] sm:$0xff]  ;;  %v21_v9 = vld [vmem:[%s327_s0 + $0x8] sm:$0xff]  ;;  %v23_v11 = vld [vmem:[%s327_s0 + $0x18] sm:$0xff] }
   0x5   :  { %195 = vmatpush.msra.mxu2 %v30_v1  ;;  %196 = vmatpush.msra.mxu3 %v30_v1  ;;  %v216_v14 = vld [vmem:[%s326_s2] ss:$0 sm:$0xff] }
   0x6   :  { %59 = vmatpush.msra.mxu0 %v29_v2  ;;  %197 = vmatpush.msra.mxu1 %v29_v2 }
   0x7   :  { %198 = vmatpush.msra.mxu2 %v29_v2  ;;  %199 = vmatpush.msra.mxu3 %v29_v2  ;;  %v220_v13 = vpop.eup %219 }
   0x8   :  { %60 = vmatpush.msra.mxu0 %v28_v3  ;;  %200 = vmatpush.msra.mxu1 %v28_v3  ;;  %v91_v15 = vmul.f32 16.0, %v220_v13  ;;  %vm95_vm2 = vweird.f32 %v220_v13 }
   0x9   :  { %201 = vmatpush.msra.mxu2 %v28_v3  ;;  %202 = vmatpush.msra.mxu3 %v28_v3 }
   0xa   :  { %61 = vmatpush.msra.mxu0 %v27_v4  ;;  %203 = vmatpush.msra.mxu1 %v27_v4  ;;  %v92_v22 = vsub.f32 1.0, %v91_v15 }
   0xb   :  { %204 = vmatpush.msra.mxu2 %v27_v4  ;;  %205 = vmatpush.msra.mxu3 %v27_v4 }
   0xc   :  { %62 = vmatpush.msra.mxu0 %v26_v5  ;;  %206 = vmatpush.msra.mxu1 %v26_v5  ;;  %v93_v25 = vmul.f32 %v220_v13, %v92_v22  ;;  %v217_v22 = vld [vmem:[%s328_s3] ss:$0 sm:$0xff] }
   0xd   :  { %207 = vmatpush.msra.mxu2 %v26_v5  ;;  %208 = vmatpush.msra.mxu3 %v26_v5 }
   0xe   :  { %63 = vmatpush.msra.mxu0 %v25_v6  ;;  %209 = vmatpush.msra.mxu1 %v25_v6  ;;  %v94_v34 = vadd.f32 %v220_v13, %v93_v25 }
   0xf   :  { %210 = vmatpush.msra.mxu2 %v25_v6  ;;  %211 = vmatpush.msra.mxu3 %v25_v6 }
  0x10   :  { %64 = vmatpush.msra.mxu0 %v24_v7  ;;  %212 = vmatpush.msra.mxu1 %v24_v7  ;;  %v96_v39 = vsel %vm95_vm2, %v220_v13, %v94_v34 }
  0x11   :  { %213 = vmatpush.msra.mxu2 %v24_v7  ;;  %214 = vmatpush.msra.mxu3 %v24_v7 }
  0x12   :  { %185 = vmatmul.msk.f32.vlgmr.msra.gmra.mxu0 %vm36_vm0, %v20_v8  ;;  %186 = vmatmul.msk.f32.vlgmr.msra.gmra.mxu1 %vm36_vm0, %v21_v9 }
  0x13   :  { %187 = vmatmul.msk.f32.vlgmr.msra.gmra.mxu2 %vm36_vm0, %v22_v10  ;;  %188 = vmatmul.msk.f32.vlgmr.msra.gmra.mxu3 %vm36_vm0, %v23_v11 }
  0x8f   :  { %v66_v16 = vpop.f32.mrf.mxu0  ;;  %v69_v17 = vpop.f32.mrf.mxu1 }
  0x90   :  { %v67_v18 = vadd.f32 %v216_v14, %v66_v16  ;;  %v70_v19 = vadd.f32 %v216_v14, %v69_v17 }
  0x92   :  { %v81_v20 = vsel %vm80_vm1, %v67_v18, 0.0  ;;  %v82_v21 = vsel %vm80_vm1, %v70_v19, 0.0 }
  0x93   :  { %v83_v23 = vadd.f32 %v82_v21, %v81_v20 }
  0x95   :  { %v84_v24 = vrot.slane %v83_v23, 4 }
  0x96   :  { %v72_v26 = vpop.f32.mrf.mxu2  ;;  %v75_v27 = vpop.f32.mrf.mxu3 }
  0x97   :  { %v85_v28 = vadd.f32 %v84_v24, %v83_v23  ;;  %v73_v29 = vadd.f32 %v216_v14, %v72_v26  ;;  %v76_v30 = vadd.f32 %v216_v14, %v75_v27  ;;  %v218_v27 = vld [vmem:[%s329_s4] ss:$0 sm:$0xff] }
  0x99   :  { %v86_v31 = vrot.slane %v85_v28, 2  ;;  %v137_v32 = vsel %vm80_vm1, %v73_v29, 0.0  ;;  %v138_v33 = vsel %vm80_vm1, %v76_v30, 0.0 }
  0x9a   :  { %v139_v35 = vadd.f32 %v138_v33, %v137_v32 }
  0x9b   :  { %v87_v36 = vadd.f32 %v86_v31, %v85_v28 }
  0x9c   :  { %v140_v37 = vrot.slane %v139_v35, 4 }
  0x9d   :  { %v88_v38 = vrot.slane %v87_v36, 1 }
  0x9e   :  { %v141_v40 = vadd.f32 %v140_v37, %v139_v35 }
  0x9f   :  { %v89_v41 = vadd.f32 %v88_v38, %v87_v36 }
  0xa0   :  { %v142_v42 = vrot.slane %v141_v40, 2 }
  0xa1   :  { %v97_v43 = vmul.f32 %v96_v39, %v89_v41 }
  0xa2   :  { %v143_v44 = vadd.f32 %v142_v42, %v141_v40 }
  0xa3   :  { %v98_v45 = vsub.f32 %v67_v18, %v97_v43  ;;  %v99_v46 = vsub.f32 %v70_v19, %v97_v43 }
  0xa4   :  { %v144_v47 = vrot.slane %v143_v44, 1 }
  0xa5   :  { %v100_v48 = vmul.f32 %v98_v45, %v98_v45  ;;  %v101_v49 = vmul.f32 %v99_v46, %v99_v46 }
  0xa6   :  { %v145_v50 = vadd.f32 %v144_v47, %v143_v44 }
  0xa7   :  { %v102_v51 = vsel %vm80_vm1, %v100_v48, 0.0  ;;  %v103_v52 = vsel %vm80_vm1, %v101_v49, 0.0 }
  0xa8   :  { %v104_v53 = vadd.f32 %v103_v52, %v102_v51  ;;  %v146_v54 = vmul.f32 %v145_v50, %v96_v39 }
  0xaa   :  { %v105_v55 = vrot.slane %v104_v53, 4  ;;  %v147_v56 = vsub.f32 %v73_v29, %v146_v54  ;;  %v148_v57 = vsub.f32 %v76_v30, %v146_v54 }
  0xac   :  { %v106_v58 = vadd.f32 %v105_v55, %v104_v53  ;;  %v149_v59 = vmul.f32 %v147_v56, %v147_v56  ;;  %v150_v60 = vmul.f32 %v148_v57, %v148_v57 }
  0xae   :  { %v107_v61 = vrot.slane %v106_v58, 2  ;;  %v151_v62 = vsel %vm80_vm1, %v149_v59, 0.0  ;;  %v152_v63 = vsel %vm80_vm1, %v150_v60, 0.0 }
  0xaf   :  { %v153_v0 = vadd.f32 %v152_v63, %v151_v62 }
  0xb0   :  { %v108_v1 = vadd.f32 %v107_v61, %v106_v58 }
  0xb1   :  { %v154_v2 = vrot.slane %v153_v0, 4 }
  0xb2   :  { %v109_v3 = vrot.slane %v108_v1, 1 }
  0xb3   :  { %v155_v4 = vadd.f32 %v154_v2, %v153_v0 }
  0xb4   :  { %v110_v5 = vadd.f32 %v109_v3, %v108_v1 }
  0xb5   :  { %v156_v6 = vrot.slane %v155_v4, 2 }
  0xb6   :  { %v111_v7 = vmul.f32 %v110_v5, %v96_v39 }
  0xb7   :  { %v157_v8 = vadd.f32 %v156_v6, %v155_v4 }
  0xb8   :  { %v112_v9 = vadd.f32 1e-05, %v111_v7 }
  0xb9   :  { %v158_v10 = vrot.slane %v157_v8, 1 }
  0xba   :  { %221 = vrsqrt.f32 %v112_v9  ;;  %vm119_vm4 = vweird.f32 %v112_v9 }
  0xbb   :  { %v159_v11 = vadd.f32 %v158_v10, %v157_v8 }
  0xbd   :  { %v160_v12 = vmul.f32 %v159_v11, %v96_v39 }
  0xbf   :  { %v161_v13 = vadd.f32 1e-05, %v160_v12 }
  0xc0   :  { %v222_v14 = vpop.eup %221 }
  0xc1   :  { %v114_v15 = vmul.f32 %v222_v14, %v112_v9  ;;  %223 = vrsqrt.f32 %v161_v13  ;;  %vm120_vm3 = vweird.f32 %v222_v14  ;;  %vm168_vm7 = vweird.f32 %v161_v13 }
  0xc2   :  { %vm121_vm5 = vmor %vm119_vm4, %vm120_vm3 }
  0xc3   :  { %v115_v16 = vmul.f32 %v222_v14, %v114_v15 }
  0xc5   :  { %v116_v17 = vmul.f32 0.5, %v115_v16 }
  0xc7   :  { %v224_v18 = vpop.eup %223  ;;  %v117_v19 = vsub.f32 1.5, %v116_v17 }
  0xc8   :  { %v163_v20 = vmul.f32 %v224_v18, %v161_v13  ;;  %vm169_vm6 = vweird.f32 %v224_v18 }
  0xc9   :  { %v118_v21 = vmul.f32 %v222_v14, %v117_v19  ;;  %vm170_vm8 = vmor %vm168_vm7, %vm169_vm6 }
  0xca   :  { %v164_v23 = vmul.f32 %v224_v18, %v163_v20 }
  0xcb   :  { %v122_v24 = vsel %vm121_vm5, %v222_v14, %v118_v21 }
  0xcc   :  { %v123_v25 = vmul.f32 %v122_v24, %v98_v45  ;;  %v124_v26 = vmul.f32 %v122_v24, %v99_v46  ;;  %v165_v28 = vmul.f32 0.5, %v164_v23 }
  0xce   :  { %v128_v29 = vmul.f32 %v217_v22, %v123_v25  ;;  %v129_v30 = vmul.f32 %v217_v22, %v124_v26  ;;  %v166_v31 = vsub.f32 1.5, %v165_v28 }
  0xd0   :  { %v133_v32 = vadd.f32 %v218_v27, %v128_v29  ;;  %v134_v33 = vadd.f32 %v218_v27, %v129_v30  ;;  %v167_v34 = vmul.f32 %v224_v18, %v166_v31 }
  0xd2   :  { %135 = vst.msk [vmem:[%s330_s5] sm:$0xff] %vm80_vm1, %v133_v32  ;;  %v171_v35 = vsel %vm170_vm8, %v224_v18, %v167_v34 }
  0xd3   :  { %136 = vst.msk [vmem:[%s330_s5 + $0x8] sm:$0xff] %vm80_vm1, %v134_v33  ;;  %v172_v36 = vmul.f32 %v171_v35, %v147_v56  ;;  %v173_v37 = vmul.f32 %v171_v35, %v148_v57 }
  0xd5   :  { %v174_v38 = vmul.f32 %v217_v22, %v172_v36  ;;  %v175_v39 = vmul.f32 %v217_v22, %v173_v37 }
  0xd7   :  { %v176_v40 = vadd.f32 %v218_v27, %v174_v38  ;;  %v177_v41 = vadd.f32 %v218_v27, %v175_v39 }
  0xd9   :  { %189 = vst.msk [vmem:[%s330_s5 + $0x10] sm:$0xff] %vm80_vm1, %v176_v40 }
  0xda   :  { %190 = vst.msk [vmem:[%s330_s5 + $0x18] sm:$0xff] %vm80_vm1, %v177_v41 }

// kernel: deformable_detr_forward.3
= control target key start
LH: loop header
LB: loop body
LE: loop exit
PB: predicated region body
PF: predicated region fallthrough
CT: control target
= control target key end

     0   :  { %s3509_s27 = smov 0   ;;  %s4290_s0 = inlined_call_operand.vmem [shape: f32[2,32,32], index: 0, kind: input, shape index: {}]   ;;  %s4291_s1 = inlined_call_operand.vmem [shape: f32[2,32,32], index: 1, kind: input, shape index: {}]   ;;  %s4292_s2 = inlined_call_operand.vmem [shape: f32[2,32,2], index: 2, kind: input, shape index: {}]   ;;  %s4293_s3 = inlined_call_operand.vmem [shape: f32[2,32,256], index: 3, kind: input, shape index: {}]   ;;  %s4294_s4 = inlined_call_operand.vmem [shape: f32[256,32], index: 4, kind: input, shape index: {}]   ;;  %s4295_s5 = inlined_call_operand.vmem [shape: f32[2,32,32], index: 5, kind: input, shape index: {}]   ;;  %s4296_s6 = inlined_call_operand.vmem [shape: f32[2,1,32], index: 6, kind: input, shape index: {}]   ;;  %s4297_s7 = inlined_call_operand.vmem [shape: f32[2,32,64], index: 7, kind: input, shape index: {}]   ;;  %s4298_s8 = inlined_call_operand.vmem [shape: f32[2,1,64], index: 8, kind: input, shape index: {}]   ;;  %s4299_s9 = inlined_call_operand.vmem [shape: f32[2,32,32], index: 9, kind: input, shape index: {}]   ;;  %s4300_s10 = inlined_call_operand.vmem [shape: f32[2,1,32], index: 10, kind: input, shape index: {}]   ;;  %s4301_s11 = inlined_call_operand.vmem [shape: f32[2,32,128], index: 11, kind: input, shape index: {}]   ;;  %s4302_s12 = inlined_call_operand.vmem [shape: f32[2,1,128], index: 12, kind: input, shape index: {}]   ;;  %s4303_s13 = inlined_call_operand.vmem [shape: f32[2,32,64], index: 13, kind: input, shape index: {}]   ;;  %s4304_s14 = inlined_call_operand.vmem [shape: f32[2,1,64], index: 14, kind: input, shape index: {}]   ;;  %s4305_s15 = inlined_call_operand.vmem [shape: f32[2,64,64], index: 15, kind: input, shape index: {}]   ;;  %s4306_s16 = inlined_call_operand.vmem [shape: f32[2,1,64], index: 16, kind: input, shape index: {}]   ;;  %s4307_s17 = inlined_call_operand.vmem [shape: f32[2,64,64], index: 17, kind: input, shape index: {}]   ;;  %s4308_s18 = inlined_call_operand.vmem [shape: f32[2,1,64], index: 18, kind: input, shape index: {}]   ;;  %s4309_s19 = inlined_call_operand.vmem [shape: f32[2,64,64], index: 19, kind: input, shape index: {}]   ;;  %s4310_s20 = inlined_call_operand.vmem [shape: f32[2,1,64], index: 20, kind: input, shape index: {}]   ;;  %s4311_s21 = inlined_call_operand.vmem [shape: f32[2,64,64], index: 21, kind: input, shape index: {}]   ;;  %s4312_s22 = inlined_call_operand.vmem [shape: f32[2,1,64], index: 22, kind: input, shape index: {}]   ;;  %s4313_s23 = inlined_call_operand.vmem [shape: f32[2,64,128], index: 23, kind: input, shape index: {}]   ;;  %s4314_s24 = inlined_call_operand.vmem [shape: f32[2,1,128], index: 24, kind: input, shape index: {}]   ;;  %s4315_s25 = inlined_call_operand.vmem [shape: f32[2,4,128], index: 25, kind: input, shape index: {}]   ;;  %s4316_s26 = inlined_call_operand.vmem [shape: f32[2,32,128], index: 26, kind: output, shape index: {}]  }
   0x1   :  { %4324 = sst [smem:[#allocation3_spill]] %s4290_s0 }
   0x2   :  { %4325 = sst [smem:[#allocation4_spill]] %s4291_s1 }
   0x3   :  { %4326 = sst [smem:[#allocation5_spill]] %s4292_s2 }
   0x4   :  { %4327 = sst [smem:[#allocation6_spill]] %s4293_s3 }
   0x5   :  { %4328 = sst [smem:[#allocation7_spill]] %s4294_s4 }
   0x6   :  { %4329 = sst [smem:[#allocation8_spill]] %s4295_s5 }
   0x7   :  { %4330 = sst [smem:[#allocation9_spill]] %s4296_s6 }
   0x8   :  { %4331 = sst [smem:[#allocation10_spill]] %s4297_s7 }
   0x9   :  { %4332 = sst [smem:[#allocation11_spill]] %s4298_s8 }
   0xa   :  { %4333 = sst [smem:[#allocation12_spill]] %s4299_s9 }
   0xb   :  { %4334 = sst [smem:[#allocation13_spill]] %s4300_s10 }
   0xc   :  { %4335 = sst [smem:[#allocation14_spill]] %s4301_s11 }
   0xd LB: > { %4336 = sst [smem:[#allocation2_spill]] %s3368_s27  ;;  %s3057_s3 = sadd.s32 4294967295, %s3368_s27   ;;  %s3368_s27 = sphi %s3509_s27, %s36_s27  }
   0xe   : > { %p3061_p0 = scmp.ge.s32.totalorder %s3368_s27, 1  ;;  %p931_p1 = scmp.lt.s32.totalorder %s3368_s27, 3 }
  0x10   : > { %p932_p2 = pnand %p3061_p0, %p931_p1 }
  0x11   : > { %s4337_s8 = sld [smem:[#allocation7_spill]] (!%p932_p2)  ;;  %p1100_p3 = scmp.lt.s32.totalorder (!%p932_p2), %s3057_s3, 1 }
  0x12   : > { %935 = sbr.rel (%p932_p2) target bundleno = 1685 (0x695), region = 124  ;;  %s3370_s30 = smov (!%p932_p2), 32  }
  0x13   : > { %s4338_s6 = sld [smem:[#allocation10_spill]] (!%p932_p2)  ;;  %s3371_s10 = smov (!%p932_p2), 96  }
  0x14   : > { %s4340_s29 = sld [smem:[#allocation11_spill]] (!%p932_p2) }
  0x15   : > { %s4343_s4 = sld [smem:[#allocation9_spill]] (!%p932_p2) }
  0x16   : > { %s4348_s11 = sld [smem:[#allocation14_spill]] (!%p932_p2) }
  0x17   : > { %v3520_v0 = vld [vmem:[%s4337_s8 + $0x78] sm:$0xff]  ;;  %v3525_v1 = vld [vmem:[%s4337_s8 + $0x70] sm:$0xff]  ;;  %v3530_v2 = vld [vmem:[%s4337_s8 + $0x68] sm:$0xff]  ;;  %s4354_s3 = smov (!%p1100_p3, %s3057_s3), 1  ;;  %vm1225_vm0 = vcmask 261120  }
  0x18   : > { %1442 = vrot.lane.b32.xlu0 %v3520_v0, %s3370_s30  ;;  %1440 = vrot.lane.b32.xlu1 %v3525_v1, %s3370_s30  ;;  %s3541_s2 = sshll.u32 %s4354_s3, 5  ;;  %v3550_v4 = vld [vmem:[%s4337_s8 + $0xf8] sm:$0xff]  ;;  %v3555_v5 = vld [vmem:[%s4337_s8 + $0xf0] sm:$0xff] }
  0x19   : > { %1438 = vrot.lane.b32.xlu2 %v3530_v2, %s3370_s30  ;;  %s1132_s1 = scalar_lea.vmem %s4338_s6, %s3541_s2  ;;  %v3560_v6 = vld [vmem:[%s4337_s8 + $0xe8] sm:$0xff]  ;;  %s4339_s6 = sld [smem:[#allocation4_spill]]  ;;  %v3582_v11 = vld [vmem:[%s4337_s8 + $0xe0] sm:$0xff]  ;;  %v3593_v13 = vld [vmem:[%s4337_s8 + $0x58] sm:$0xff] }
  0x1a   : > { %v1270_v3 = vld [vmem:[%s1132_s1 + $0x18] sm:$0xff]  ;;  %v1269_v7 = vld [vmem:[%s1132_s1 + $0x10] sm:$0xff]  ;;  %v1268_v8 = vld [vmem:[%s1132_s1 + $0x8] sm:$0xff] }
  0x1b   : > { %1299 = vmatpush.msra.mxu1 %v1270_v3  ;;  %v1267_v9 = vld [vmem:[%s1132_s1] sm:$0xff]  ;;  %v3605_v15 = vld [vmem:[%s4337_s8 + $0xd8] sm:$0xff]  ;;  %v3610_v16 = vld [vmem:[%s4337_s8 + $0x50] sm:$0xff]  ;;  %s1127_s9 = scalar_lea.vmem %s4343_s4, %s4354_s3  ;;  %s3999_s1 = sshll.u32 %s4354_s3, 6 }
  0x1c   : > { %v3587_v12 = vld [vmem:[%s4337_s8 + $0x60] sm:$0xff]  ;;  %v3616_v17 = vld [vmem:[%s4337_s8 + $0xd0] sm:$0xff]  ;;  %v3628_v19 = vld [vmem:[%s4337_s8 + $0xc8] sm:$0xff]  ;;  %s4067_s0 = scalar_lea.vmem %s4305_s15, %s3999_s1  ;;  %s4160_s4 = scalar_lea.vmem %s4311_s21, %s3999_s1 }
  0x1d   : > { %1300 = vmatpush.msra.mxu1 %v1269_v7  ;;  %v3633_v20 = vld [vmem:[%s4337_s8 + $0x48] sm:$0xff]  ;;  %v3639_v21 = vld [vmem:[%s4337_s8 + $0x40] sm:$0xff]  ;;  %v3656_v24 = vld [vmem:[%s4337_s8 + $0x38] sm:$0xff] }
  0x1e   : > { %v3651_v23 = vld [vmem:[%s4337_s8 + $0xc0] sm:$0xff]  ;;  %v3662_v25 = vld [vmem:[%s4337_s8 + $0xb8] sm:$0xff]  ;;  %v3673_v26 = vld [vmem:[%s4337_s8 + $0xb0] sm:$0xff] }
  0x1f   : > { %s3570_s7 = scalar_lea.vmem %s4339_s6, %s3541_s2  ;;  %1301 = vmatpush.msra.mxu1 %v1268_v8  ;;  %v3678_v27 = vld [vmem:[%s4337_s8 + $0x30] sm:$0xff]  ;;  %v3683_v28 = vld [vmem:[%s4337_s8 + $0x28] sm:$0xff]  ;;  %v3699_v30 = vld [vmem:[%s4337_s8 + $0x20] sm:$0xff]  ;;  %s4341_s6 = sld [smem:[#allocation8_spill]] }
  0x20   : > { %1474 = vrot.lane.b32.xlu0 %v3550_v4, %s3370_s30  ;;  %1472 = vrot.lane.b32.xlu1 %v3555_v5, %s3370_s30  ;;  %v1213_v10 = vld [vmem:[%s3570_s7] sm:$0xff]  ;;  %v1214_v14 = vld [vmem:[%s3570_s7 + $0x8] sm:$0xff] }
  0x21   : > { %1470 = vrot.lane.b32.xlu2 %v3560_v6, %s3370_s30  ;;  %1302 = vmatpush.msra.mxu1 %v1267_v9  ;;  %v1215_v18 = vld [vmem:[%s3570_s7 + $0x10] sm:$0xff]  ;;  %v1216_v22 = vld [vmem:[%s3570_s7 + $0x18] sm:$0xff]  ;;  %v3694_v29 = vld [vmem:[%s4337_s8 + $0xa8] sm:$0xff]  ;;  %s1156_s7 = scalar_lea.vmem %s4303_s13, %s3541_s2 }
  0x22   : > { %3097 = vmatmul.msk.f32.vlgmr.msra.gmra.mxu1 %vm1225_vm0, %v1213_v10  ;;  %v3704_v31 = vld [vmem:[%s4337_s8 + $0xa0] sm:$0xff]  ;;  %v3719_v34 = vld [vmem:[%s4337_s8 + $0x98] sm:$0xff]  ;;  %v3729_v36 = vld [vmem:[%s4337_s8 + $0x10] sm:$0xff] }
  0x23   : > { %v3724_v35 = vld [vmem:[%s4337_s8 + $0x18] sm:$0xff]  ;;  %v3747_v40 = vld [vmem:[%s4337_s8 + $0x90] sm:$0xff]  ;;  %v3752_v41 = vld [vmem:[%s4337_s8 + $0x8] sm:$0xff] }
  0x24   : > { %v3757_v42 = vld [vmem:[%s4337_s8 + $0x88] sm:$0xff]  ;;  %v3770_v44 = vld [vmem:[%s4337_s8 + $0x80] sm:$0xff] }
  0x25   : > { %s1124_s28 = scalar_lea.vmem %s4341_s6, %s3541_s2  ;;  %s4342_s6 = sld [smem:[#allocation3_spill]]  ;;  %v3775_v45 = vld [vmem:[%s4337_s8] sm:$0xff] }
  0x26   : > { %v1220_v32 = vld [vmem:[%s1124_s28 + $0x18] sm:$0xff]  ;;  %v1219_v33 = vld [vmem:[%s1124_s28 + $0x10] sm:$0xff]  ;;  %v1218_v37 = vld [vmem:[%s1124_s28 + $0x8] sm:$0xff]  ;;  %s1183_s8 = scalar_lea.vmem %s4310_s20, %s4354_s3 }
  0x27   : > { %1250 = vmatpush.msra.mxu0 %v1220_v32  ;;  %v1217_v38 = vld [vmem:[%s1124_s28] sm:$0xff]  ;;  %s4344_s28 = scalar_lea.vmem %s4340_s29, %s4354_s3 }
  0x28   : > { %1468 = vrot.lane.b32.xlu1 %v3582_v11, %s3370_s30  ;;  %1436 = vrot.lane.b32.xlu0 %v3587_v12, %s3370_s30  ;;  %v3292_v58 = vld [vmem:[%s4344_s28] ss:$0 sm:$0xff]  ;;  %s4133_s28 = scalar_lea.vmem %s4309_s19, %s3999_s1 }
  0x29   : > { %1434 = vrot.lane.b32.xlu2 %v3593_v13, %s3370_s30  ;;  %1251 = vmatpush.msra.mxu0 %v1219_v33 }
  0x2a   : > { %3098 = vmatmul.msk.f32.gmra.mxu1 %vm1225_vm0, %v1214_v14 }
  0x2b   : > { %s3741_s27 = scalar_lea.vmem %s4342_s6, %s3541_s2  ;;  %1252 = vmatpush.msra.mxu0 %v1218_v37  ;;  %s4346_s6 = sld [smem:[#allocation13_spill]] }
  0x2c   : > { %v1209_v39 = vld [vmem:[%s3741_s27] sm:$0xff]  ;;  %v1210_v43 = vld [vmem:[%s3741_s27 + $0x8] sm:$0xff]  ;;  %v1211_v46 = vld [vmem:[%s3741_s27 + $0x10] sm:$0xff] }
  0x2d   : > { %1253 = vmatpush.msra.mxu0 %v1217_v38  ;;  %v1212_v47 = vld [vmem:[%s3741_s27 + $0x18] sm:$0xff] }
  0x2e   : > { %3093 = vmatmul.msk.f32.vlgmr.msra.gmra.mxu0 %vm1225_vm0, %v1209_v39 }
  0x30   : > { %1466 = vrot.lane.b32.xlu0 %v3605_v15, %s3370_s30  ;;  %1432 = vrot.lane.b32.xlu1 %v3610_v16, %s3370_s30 }
  0x31   : > { %1464 = vrot.lane.b32.xlu2 %v3616_v17, %s3370_s30 }
  0x32   : > { %3099 = vmatmul.msk.f32.gmra.mxu1 %vm1225_vm0, %v1215_v18 }
  0x36   : > { %3094 = vmatmul.msk.f32.gmra.mxu0 %vm1225_vm0, %v1210_v43 }
  0x38   : > { %1462 = vrot.lane.b32.xlu1 %v3628_v19, %s3370_s30  ;;  %1430 = vrot.lane.b32.xlu0 %v3633_v20, %s3370_s30 }
  0x39   : > { %1428 = vrot.lane.b32.xlu2 %v3639_v21, %s3370_s30 }
  0x3a   : > { %3100 = vmatmul.msk.f32.gmra.mxu1 %vm1225_vm0, %v1216_v22 }
  0x3e   : > { %3095 = vmatmul.msk.f32.gmra.mxu0 %vm1225_vm0, %v1211_v46 }
  0x40   : > { %1460 = vrot.lane.b32.xlu0 %v3651_v23, %s3370_s30  ;;  %1426 = vrot.lane.b32.xlu1 %v3656_v24, %s3370_s30 }
  0x41   : > { %1458 = vrot.lane.b32.xlu2 %v3662_v25, %s3370_s30 }
  0x46   : > { %3096 = vmatmul.msk.f32.gmra.mxu0 %vm1225_vm0, %v1212_v47 }
  0x48   : > { %1456 = vrot.lane.b32.xlu1 %v3673_v26, %s3370_s30  ;;  %1424 = vrot.lane.b32.xlu0 %v3678_v27, %s3370_s30 }
  0x49   : > { %1422 = vrot.lane.b32.xlu2 %v3683_v28, %s3370_s30 }
  0x50   : > { %1454 = vrot.lane.b32.xlu0 %v3694_v29, %s3370_s30  ;;  %1420 = vrot.lane.b32.xlu1 %v3699_v30, %s3370_s30 }
  0x51   : > { %1452 = vrot.lane.b32.xlu2 %v3704_v31, %s3370_s30 }
  0x58   : > { %1450 = vrot.lane.b32.xlu1 %v3719_v34, %s3370_s30  ;;  %1418 = vrot.lane.b32.xlu0 %v3724_v35, %s3370_s30 }
  0x59   : > { %1416 = vrot.lane.b32.xlu2 %v3729_v36, %s3370_s30 }
  0x60   : > { %1448 = vrot.lane.b32.xlu0 %v3747_v40, %s3370_s30  ;;  %1414 = vrot.lane.b32.xlu1 %v3752_v41, %s3370_s30 }
  0x61   : > { %1446 = vrot.lane.b32.xlu2 %v3757_v42, %s3370_s30 }
  0x68   : > { %1444 = vrot.lane.b32.xlu1 %v3770_v44, %s3370_s30  ;;  %1412 = vrot.lane.b32.xlu0 %v3775_v45, %s3370_s30  ;;  %s4345_s30 = sld [smem:[#allocation6_spill]] }
  0x6e   : > { %s4005_s5 = scalar_lea.vmem %s4345_s30, %s3999_s1  ;;  %s4347_s30 = sld [smem:[#allocation12_spill]] }
  0x73   : > { %v1439_v48 = vpop.permute.xlu2 %1438 }
  0x7b   : > { %v1471_v49 = vpop.permute.xlu2 %1470 }
  0x83   : > { %v3792_v52 = vpop.permute.xlu2 %1434 }
  0x8a   : > { %v3790_v50 = vpop.permute.xlu0 %1442  ;;  %v1441_v51 = vpop.permute.xlu1 %1440 }
  0x8b   : > { %v1465_v57 = vpop.permute.xlu2 %1464 }
  0x92   : > { %v1475_v53 = vpop.permute.xlu0 %1474  ;;  %v1473_v54 = vpop.permute.xlu1 %1472 }
  0x93   : > { %v1429_v63 = vpop.permute.xlu2 %1428 }
  0x9a   : > { %v1469_v55 = vpop.permute.xlu1 %1468  ;;  %v1437_v56 = vpop.permute.xlu0 %1436 }
  0x9b   : > { %v1459_v38 = vpop.permute.xlu2 %1458 }
  0x9f   : > { %v1304_v61 = vpop.f32.mrf.mxu1 }
  0xa0   : > { %v3799_v62 = vadd.f32 %v3292_v58, %v1304_v61 }
  0xa2   : > { %v1467_v59 = vpop.permute.xlu0 %1466  ;;  %v1433_v60 = vpop.permute.xlu1 %1432  ;;  %v1520_v3 = vmul.f32 %v1437_v56, %v3799_v62  ;;  %v1536_v7 = vmul.f32 %v1469_v55, %v3799_v62  ;;  %v1516_v55 = vmul.f32 %v1429_v63, %v3799_v62 }
  0xa4   : > { %v3206_v8 = vpack.i.bf16 %v1536_v7, %v1520_v3 }
  0xa6   : > { %3207 = vrot.lane.b32.xlu2 %v3206_v8, %s3371_s10 }
  0xa7   : > { %v1307_v14 = vpop.f32.mrf.mxu1 }
  0xa8   : > { %v3804_v18 = vadd.f32 %v3292_v58, %v1307_v14 }
  0xaa   : > { %v1463_v9 = vpop.permute.xlu1 %1462  ;;  %v1431_v10 = vpop.permute.xlu0 %1430  ;;  %v1521_v22 = vmul.f32 %v1439_v48, %v3804_v18  ;;  %v1537_v32 = vmul.f32 %v1471_v49, %v3804_v18 }
  0xab   : > { %v1517_v33 = vmul.f32 %v1431_v10, %v3804_v18  ;;  %v1533_v37 = vmul.f32 %v1463_v9, %v3804_v18  ;;  %v1423_v9 = vpop.permute.xlu2 %1422 }
  0xac   : > { %v3216_v39 = vpack.i.bf16 %v1537_v32, %v1521_v22 }
  0xad   : > { %v3221_v43 = vpack.i.bf16 %v1533_v37, %v1517_v33 }
  0xae   : > { %3217 = vrot.lane.b32.xlu1 %v3216_v39, %s3371_s10 }
  0xaf   : > { %3222 = vrot.lane.b32.xlu2 %v3221_v43, %s3371_s10  ;;  %v1310_v48 = vpop.f32.mrf.mxu1 }
  0xb0   : > { %v3814_v61 = vadd.f32 %v3292_v58, %v1310_v48 }
  0xb2   : > { %v1461_v46 = vpop.permute.xlu0 %1460  ;;  %v1427_v47 = vpop.permute.xlu1 %1426  ;;  %v1518_v3 = vmul.f32 %v1433_v60, %v3814_v61  ;;  %v1534_v7 = vmul.f32 %v1465_v57, %v3814_v61  ;;  %v1522_v10 = vmul.f32 %v1441_v51, %v3814_v61  ;;  %v1538_v14 = vmul.f32 %v1473_v54, %v3814_v61 }
  0xb3   : > { %v1532_v56 = vmul.f32 %v1461_v46, %v3799_v62 }
  0xb4   : > { %v3231_v8 = vpack.i.bf16 %v1534_v7, %v1518_v3  ;;  %v3226_v39 = vpack.i.bf16 %v1538_v14, %v1522_v10  ;;  %v1362_v3 = vmul.f32 %v3525_v1, %v3814_v61  ;;  %v1378_v7 = vmul.f32 %v3555_v5, %v3814_v61 }
  0xb5   : > { %v3211_v49 = vpack.i.bf16 %v1532_v56, %v1516_v55  ;;  %v1361_v10 = vmul.f32 %v3530_v2, %v3804_v18  ;;  %v1377_v14 = vmul.f32 %v3560_v6, %v3804_v18 }
  0xb6   : > { %3232 = vrot.lane.b32.xlu1 %v3231_v8, %s3371_s10  ;;  %v1453_v8 = vpop.permute.xlu2 %1452 }
  0xb7   : > { %3212 = vrot.lane.b32.xlu0 %v3211_v49, %s3371_s10  ;;  %v1313_v37 = vpop.f32.mrf.mxu1 }
  0xb8   : > { %v3824_v60 = vadd.f32 %v3292_v58, %v1313_v37  ;;  %v1376_v37 = vmul.f32 %v3582_v11, %v3799_v62 }
  0xba   : > { %v1457_v63 = vpop.permute.xlu1 %1456  ;;  %v1425_v22 = vpop.permute.xlu0 %1424  ;;  %v1363_v43 = vmul.f32 %v3520_v0, %v3824_v60  ;;  %v1379_v51 = vmul.f32 %v3550_v4, %v3824_v60  ;;  %v1515_v54 = vmul.f32 %v1427_v47, %v3824_v60  ;;  %v1531_v46 = vmul.f32 %v1459_v38, %v3824_v60 }
  0xbb   : > { %v1530_v32 = vmul.f32 %v1457_v63, %v3814_v61  ;;  %v1514_v33 = vmul.f32 %v1425_v22, %v3814_v61  ;;  %v1523_v55 = vmul.f32 %v3790_v50, %v3824_v60  ;;  %v1539_v56 = vmul.f32 %v1475_v53, %v3824_v60 }
  0xbc   : > { %3101 = vmatpush.xpose.msk.msra.mxu2 %vm1225_vm0, %v1363_v43  ;;  %3121 = vmatpush.xpose.msk.msra.mxu3 %vm1225_vm0, %v1379_v51  ;;  %v3251_v58 = vpack.i.bf16 %v1531_v46, %v1515_v54  ;;  %v1519_v48 = vmul.f32 %v3792_v52, %v3824_v60  ;;  %v1535_v47 = vmul.f32 %v1467_v59, %v3824_v60 }
  0xbd   : > { %v3236_v57 = vpack.i.bf16 %v1530_v32, %v1514_v33  ;;  %v3241_v52 = vpack.i.bf16 %v1539_v56, %v1523_v55  ;;  %v1513_v59 = vmul.f32 %v1423_v9, %v3804_v18  ;;  %v1360_v33 = vmul.f32 %v3587_v12, %v3799_v62 }
  0xbe   : > { %3252 = vrot.lane.b32.xlu1 %v3251_v58, %s3371_s10  ;;  %v3246_v53 = vpack.i.bf16 %v1535_v47, %v1519_v48  ;;  %v1417_v54 = vpop.permute.xlu2 %1416  ;;  %v1359_v46 = vmul.f32 %v3593_v13, %v3824_v60  ;;  %v1375_v58 = vmul.f32 %v3605_v15, %v3824_v60  ;;  %v1358_v48 = vmul.f32 %v3610_v16, %v3814_v61 }
  0xbf   : > { %3237 = vrot.lane.b32.xlu2 %v3236_v57, %s3371_s10  ;;  %3227 = vrot.lane.b32.xlu0 %v3226_v39, %s3371_s10  ;;  %v1528_v57 = vmul.f32 %v1453_v8, %v3799_v62  ;;  %v1374_v47 = vmul.f32 %v3616_v17, %v3814_v61  ;;  %v1357_v8 = vmul.f32 %v3633_v20, %v3804_v18 }
  0xc0   : > { %3102 = vmatpush.xpose.msk.msra.mxu2 %vm1225_vm0, %v1362_v3  ;;  %3122 = vmatpush.xpose.msk.msra.mxu3 %vm1225_vm0, %v1378_v7 }
  0xc2   : > { %v1455_v38 = vpop.permute.xlu0 %1454  ;;  %v1421_v49 = vpop.permute.xlu1 %1420 }
  0xc3   : > { %v1529_v50 = vmul.f32 %v1455_v38, %v3804_v18  ;;  %v1512_v22 = vmul.f32 %v1421_v49, %v3799_v62  ;;  %v1510_v38 = vmul.f32 %v1417_v54, %v3814_v61  ;;  %v1353_v54 = vmul.f32 %v3683_v28, %v3804_v18 }
  0xc4   : > { %3103 = vmatpush.xpose.msk.msra.mxu2 %vm1225_vm0, %v1361_v10  ;;  %3123 = vmatpush.xpose.msk.msra.mxu3 %vm1225_vm0, %v1377_v14  ;;  %v1372_v10 = vmul.f32 %v3651_v23, %v3799_v62 }
  0xc5   : > { %v3256_v63 = vpack.i.bf16 %v1529_v50, %v1513_v59  ;;  %v3261_v51 = vpack.i.bf16 %v1528_v57, %v1512_v22  ;;  %v1373_v50 = vmul.f32 %v3628_v19, %v3804_v18  ;;  %v1356_v59 = vmul.f32 %v3639_v21, %v3799_v62 }
  0xc7   : > { %3242 = vrot.lane.b32.xlu2 %v3241_v52, %s3371_s10  ;;  %3247 = vrot.lane.b32.xlu0 %v3246_v53, %s3371_s10  ;;  %v1447_v52 = vpop.permute.xlu2 %1446 }
  0xc8   : > { %3257 = vrot.lane.b32.xlu1 %v3256_v63, %s3371_s10  ;;  %3104 = vmatpush.xpose.msk.msra.mxu2 %vm1225_vm0, %v1360_v33  ;;  %v1525_v14 = vmul.f32 %v1447_v52, %v3804_v18  ;;  %v1371_v33 = vmul.f32 %v3662_v25, %v3824_v60 }
  0xc9   : > { %3124 = vmatpush.xpose.msk.msra.mxu3 %vm1225_vm0, %v1376_v37 }
  0xca   : > { %v1451_v9 = vpop.permute.xlu1 %1450  ;;  %v1419_v32 = vpop.permute.xlu0 %1418 }
  0xcb   : > { %v1527_v39 = vmul.f32 %v1451_v9, %v3824_v60  ;;  %v1511_v43 = vmul.f32 %v1419_v32, %v3824_v60  ;;  %v1355_v32 = vmul.f32 %v3656_v24, %v3824_v60 }
  0xcc   : > { %3105 = vmatpush.xpose.msk.msra.mxu2 %vm1225_vm0, %v1359_v46  ;;  %v1369_v46 = vmul.f32 %v3694_v29, %v3804_v18 }
  0xcd   : > { %v3266_v55 = vpack.i.bf16 %v1527_v39, %v1511_v43  ;;  %3125 = vmatpush.xpose.msk.msra.mxu3 %vm1225_vm0, %v1375_v58  ;;  %v1354_v39 = vmul.f32 %v3678_v27, %v3814_v61  ;;  %v1370_v43 = vmul.f32 %v3673_v26, %v3814_v61  ;;  %v1352_v58 = vmul.f32 %v3699_v30, %v3799_v62 }
  0xcf   : > { %3262 = vrot.lane.b32.xlu2 %v3261_v51, %s3371_s10 }
  0xd0   : > { %3267 = vrot.lane.b32.xlu1 %v3266_v55, %s3371_s10  ;;  %3106 = vmatpush.xpose.msk.msra.mxu2 %vm1225_vm0, %v1358_v48  ;;  %v1368_v55 = vmul.f32 %v3704_v31, %v3799_v62  ;;  %v1367_v48 = vmul.f32 %v3719_v34, %v3824_v60 }
  0xd1   : > { %3126 = vmatpush.xpose.msk.msra.mxu3 %vm1225_vm0, %v1374_v47  ;;  %v1350_v47 = vmul.f32 %v3729_v36, %v3814_v61 }
  0xd2   : > { %v1449_v56 = vpop.permute.xlu0 %1448  ;;  %v1415_v3 = vpop.permute.xlu1 %1414 }
  0xd3   : > { %v1526_v49 = vmul.f32 %v1449_v56, %v3814_v61  ;;  %v1509_v53 = vmul.f32 %v1415_v3, %v3804_v18  ;;  %v1351_v56 = vmul.f32 %v3724_v35, %v3824_v60  ;;  %v1349_v3 = vmul.f32 %v3752_v41, %v3804_v18 }
  0xd4   : > { %3107 = vmatpush.xpose.msk.msra.mxu2 %vm1225_vm0, %v1357_v8  ;;  %v1365_v60 = vmul.f32 %v3757_v42, %v3804_v18  ;;  %v1364_v8 = vmul.f32 %v3770_v44, %v3799_v62 }
  0xd5   : > { %v3271_v7 = vpack.i.bf16 %v1526_v49, %v1510_v38  ;;  %3127 = vmatpush.xpose.msk.msra.mxu3 %vm1225_vm0, %v1373_v50  ;;  %v3276_v63 = vpack.i.bf16 %v1525_v14, %v1509_v53  ;;  %v1366_v38 = vmul.f32 %v3747_v40, %v3814_v61  ;;  %v1255_v49 = vpop.f32.mrf.mxu0  ;;  %v1348_v61 = vmul.f32 %v3775_v45, %v3799_v62 }
  0xd7   : > { %3272 = vrot.lane.b32.xlu2 %v3271_v7, %s3371_s10  ;;  %v3293_v7 = vld [vmem:[%s1127_s9] ss:$0 sm:$0xff] }
  0xd8   : > { %3108 = vmatpush.xpose.msk.msra.mxu2 %vm1225_vm0, %v1356_v59  ;;  %v1256_v50 = vadd.f32 %v3293_v7, %v1255_v49 }
  0xd9   : > { %3128 = vmatpush.xpose.msk.msra.mxu3 %vm1225_vm0, %v1372_v10 }
  0xda   : > { %v1445_v22 = vpop.permute.xlu1 %1444  ;;  %v1413_v9 = vpop.permute.xlu0 %1412 }
  0xdb   : > { %v1524_v37 = vmul.f32 %v1445_v22, %v3799_v62  ;;  %v1508_v57 = vmul.f32 %v1413_v9, %v3799_v62 }
  0xdc   : > { %3109 = vmatpush.xpose.msk.msra.mxu2 %vm1225_vm0, %v1355_v32 }
  0xdd   : > { %3129 = vmatpush.xpose.msk.msra.mxu3 %vm1225_vm0, %v1371_v33  ;;  %v3281_v51 = vpack.i.bf16 %v1524_v37, %v1508_v57  ;;  %v1258_v18 = vpop.f32.mrf.mxu0 }
  0xde   : > { %v1259_v52 = vadd.f32 %v3293_v7, %v1258_v18 }
  0xdf   : > { %3277 = vrot.lane.b32.xlu2 %v3276_v63, %s3371_s10 }
  0xe0   : > { %3110 = vmatpush.xpose.msk.msra.mxu2 %vm1225_vm0, %v1354_v39 }
  0xe1   : > { %3130 = vmatpush.xpose.msk.msra.mxu3 %vm1225_vm0, %v1370_v43 }
  0xe4   : > { %3111 = vmatpush.xpose.msk.msra.mxu2 %vm1225_vm0, %v1353_v54 }
  0xe5   : > { %3131 = vmatpush.xpose.msk.msra.mxu3 %vm1225_vm0, %v1369_v46  ;;  %v1261_v53 = vpop.f32.mrf.mxu0 }
  0xe6   : > { %v1262_v10 = vadd.f32 %v3293_v7, %v1261_v53 }
  0xe7   : > { %3282 = vrot.lane.b32.xlu2 %v3281_v51, %s3371_s10  ;;  %s1167_s10 = scalar_lea.vmem %s4306_s16, %s4354_s3 }
  0xe8   : > { %3112 = vmatpush.xpose.msk.msra.mxu2 %vm1225_vm0, %v1352_v58 }
  0xe9   : > { %3132 = vmatpush.xpose.msk.msra.mxu3 %vm1225_vm0, %v1368_v55 }
  0xec   : > { %3113 = vmatpush.xpose.msk.msra.mxu2 %vm1225_vm0, %v1351_v56 }
  0xed   : > { %3133 = vmatpush.xpose.msk.msra.mxu3 %vm1225_vm0, %v1367_v48  ;;  %v1264_v62 = vpop.f32.mrf.mxu0 }
  0xee   : > { %v1265_v63 = vadd.f32 %v3293_v7, %v1264_v62 }
  0xf0   : > { %3114 = vmatpush.xpose.msk.msra.mxu2 %vm1225_vm0, %v1350_v47 }
  0xf1   : > { %3134 = vmatpush.xpose.msk.msra.mxu3 %vm1225_vm0, %v1366_v38 }
  0xf4   : > { %3115 = vmatpush.xpose.msk.msra.mxu2 %vm1225_vm0, %v1349_v3 }
  0xf5   : > { %3135 = vmatpush.xpose.msk.msra.mxu3 %vm1225_vm0, %v1365_v60 }
  0xf8   : > { %3116 = vmatpush.xpose.msk.msra.mxu2 %vm1225_vm0, %v1348_v61 }
  0xf9   : > { %3136 = vmatpush.xpose.msk.msra.mxu3 %vm1225_vm0, %v1364_v8 }
  0xfb   : > { %3117 = vmatmul.msk.f32.vlgmr.msra.gmra.mxu2 %vm1225_vm0, %v1256_v50 }
  0xfc   : > { %3137 = vmatmul.msk.f32.vlgmr.msra.gmra.mxu3 %vm1225_vm0, %v1256_v50 }
 0x100   : > { %v3208_v59 = vpop.permute.xlu2 %3207 }
 0x101   : > { %v3209_v48 = vunpack.i.l.bf16 %v3208_v59  ;;  %v3210_v47 = vunpack.i.h.bf16 %v3208_v59 }
 0x103   : > { %3118 = vmatmul.msk.f32.gmra.mxu2 %vm1225_vm0, %v1259_v52 }
 0x104   : > { %3138 = vmatmul.msk.f32.gmra.mxu3 %vm1225_vm0, %v1259_v52 }
 0x109   : > { %v3223_v14 = vpop.permute.xlu2 %3222 }
 0x10a   : > { %v3224_v50 = vunpack.i.l.bf16 %v3223_v14  ;;  %v3225_v18 = vunpack.i.h.bf16 %v3223_v14 }
 0x10b   : > { %3119 = vmatmul.msk.f32.gmra.mxu2 %vm1225_vm0, %v1262_v10 }
 0x10c   : > { %3139 = vmatmul.msk.f32.gmra.mxu3 %vm1225_vm0, %v1262_v10 }
 0x113   : > { %3120 = vmatmul.msk.f32.gmra.mxu2 %vm1225_vm0, %v1265_v63 }
 0x114   : > { %3140 = vmatmul.msk.f32.gmra.mxu3 %vm1225_vm0, %v1265_v63 }
 0x119   : > { %v3238_v22 = vpop.permute.xlu2 %3237 }
 0x11a   : > { %v3239_v63 = vunpack.i.l.bf16 %v3238_v22 }
 0x120   : > { %v3218_v37 = vpop.permute.xlu1 %3217 }
 0x121   : > { %v3243_v9 = vpop.permute.xlu2 %3242  ;;  %v3219_v55 = vunpack.i.l.bf16 %v3218_v37  ;;  %v3220_v56 = vunpack.i.h.bf16 %v3218_v37 }
 0x122   : > { %v3244_v32 = vunpack.i.l.bf16 %v3243_v9  ;;  %v3245_v33 = vunpack.i.h.bf16 %v3243_v9  ;;  %v3240_v9 = vunpack.i.h.bf16 %v3238_v22 }
 0x124   : > { %1902 = vmatpush.msrb.mxu0 %v3244_v32  ;;  %1931 = vmatpush.msrb.mxu1 %v3245_v33 }
 0x128   : > { %v3233_v39 = vpop.permute.xlu1 %3232 }
 0x129   : > { %v3213_v57 = vpop.permute.xlu0 %3212  ;;  %v3263_v43 = vpop.permute.xlu2 %3262  ;;  %v3234_v7 = vunpack.i.l.bf16 %v3233_v39  ;;  %v3235_v61 = vunpack.i.h.bf16 %v3233_v39 }
 0x12a   : > { %v3214_v52 = vunpack.i.l.bf16 %v3213_v57  ;;  %v3215_v53 = vunpack.i.h.bf16 %v3213_v57  ;;  %v3264_v14 = vunpack.i.l.bf16 %v3263_v43  ;;  %v3265_v39 = vunpack.i.h.bf16 %v3263_v43 }
 0x130   : > { %v3253_v58 = vpop.permute.xlu1 %3252 }
 0x131   : > { %v3228_v51 = vpop.permute.xlu0 %3227  ;;  %v3273_v38 = vpop.permute.xlu2 %3272  ;;  %v3254_v59 = vunpack.i.l.bf16 %v3253_v58  ;;  %v3255_v10 = vunpack.i.h.bf16 %v3253_v58 }
 0x132   : > { %v3229_v54 = vunpack.i.l.bf16 %v3228_v51  ;;  %v3230_v46 = vunpack.i.h.bf16 %v3228_v51 }
 0x134   : > { %1903 = vmatpush.msrb.mxu0 %v3229_v54  ;;  %1932 = vmatpush.msrb.mxu1 %v3230_v46  ;;  %v3274_v54 = vunpack.i.l.bf16 %v3273_v38  ;;  %v3275_v46 = vunpack.i.h.bf16 %v3273_v38 }
 0x136   : > { %1904 = vmatpush.msrb.mxu0 %v3219_v55  ;;  %1933 = vmatpush.msrb.mxu1 %v3220_v56 }
 0x138   : > { %1905 = vmatpush.msrb.mxu0 %v3209_v48  ;;  %1934 = vmatpush.msrb.mxu1 %v3210_v47 }
 0x139   : > { %v3248_v49 = vpop.permute.xlu0 %3247  ;;  %v3278_v62 = vpop.permute.xlu2 %3277 }
 0x13a   : > { %v3249_v3 = vunpack.i.l.bf16 %v3248_v49  ;;  %v3250_v60 = vunpack.i.h.bf16 %v3248_v49  ;;  %v3258_v8 = vpop.permute.xlu1 %3257  ;;  %v3279_v22 = vunpack.i.l.bf16 %v3278_v62  ;;  %v3280_v55 = vunpack.i.h.bf16 %v3278_v62 }
 0x13b   : > { %v3259_v32 = vunpack.i.l.bf16 %v3258_v8  ;;  %v3260_v33 = vunpack.i.h.bf16 %v3258_v8 }
 0x13c   : > { %1906 = vmatpush.msrb.mxu0 %v3249_v3  ;;  %1935 = vmatpush.msrb.mxu1 %v3250_v60 }
 0x13e   : > { %1907 = vmatpush.msrb.mxu0 %v3234_v7  ;;  %1936 = vmatpush.msrb.mxu1 %v3235_v61 }
 0x140   : > { %1908 = vmatpush.msrb.mxu0 %v3224_v50  ;;  %1937 = vmatpush.msrb.mxu1 %v3225_v18 }
 0x141   : > { %v3283_v58 = vpop.permute.xlu2 %3282 }
 0x142   : > { %1909 = vmatpush.msrb.mxu0 %v3214_v52  ;;  %1938 = vmatpush.msrb.mxu1 %v3215_v53  ;;  %v3268_v37 = vpop.permute.xlu1 %3267  ;;  %v3284_v56 = vunpack.i.l.bf16 %v3283_v58  ;;  %v3285_v48 = vunpack.i.h.bf16 %v3283_v58 }
 0x143   : > { %v3269_v57 = vunpack.i.l.bf16 %v3268_v37  ;;  %v3270_v51 = vunpack.i.h.bf16 %v3268_v37 }
 0x144   : > { %1910 = vmatpush.msrb.mxu0 %v3254_v59  ;;  %1939 = vmatpush.msrb.mxu1 %v3255_v10 }
 0x146   : > { %1911 = vmatpush.msrb.mxu0 %v3239_v63  ;;  %1940 = vmatpush.msrb.mxu1 %v3240_v9 }
 0x148   : > { %1912 = vmatpush.msrb.mxu0 %v3259_v32  ;;  %1941 = vmatpush.msrb.mxu1 %v3260_v33 }
 0x14a   : > { %1913 = vmatpush.msrb.mxu0 %v3264_v14  ;;  %1942 = vmatpush.msrb.mxu1 %v3265_v39 }
 0x14c   : > { %1914 = vmatpush.msrb.mxu0 %v3269_v57  ;;  %1943 = vmatpush.msrb.mxu1 %v3270_v51 }
 0x14e   : > { %1915 = vmatpush.msrb.mxu0 %v3274_v54  ;;  %1944 = vmatpush.msrb.mxu1 %v3275_v46 }
 0x150   : > { %1916 = vmatpush.msrb.mxu0 %v3279_v22  ;;  %1945 = vmatpush.msrb.mxu1 %v3280_v55 }
 0x152   : > { %1917 = vmatpush.msrb.mxu0 %v3284_v56  ;;  %1946 = vmatpush.msrb.mxu1 %v3285_v48 }
 0x154   : > { %1960 = vmatpush.msra.mxu0 %v3520_v0  ;;  %1989 = vmatpush.msra.mxu1 %v3550_v4  ;;  %v1714_v0 = vld [vmem:[%s4005_s5] sm:$0xff] }
 0x155   : > { %vm1722_vm1 = vcmp.gt.f32.partialorder %v1714_v0, 0.0 }
 0x156   : > { %1961 = vmatpush.msra.mxu0 %v3525_v1  ;;  %1990 = vmatpush.msra.mxu1 %v3555_v5  ;;  %v1715_v1 = vld [vmem:[%s4005_s5 + $0x8] sm:$0xff] }
 0x157   : > { %vm1723_vm2 = vcmp.gt.f32.partialorder %v1715_v1, 0.0 }
 0x158   : > { %1962 = vmatpush.msra.mxu0 %v3530_v2  ;;  %1991 = vmatpush.msra.mxu1 %v3560_v6 }
 0x15a   : > { %1963 = vmatpush.msra.mxu0 %v3587_v12  ;;  %1992 = vmatpush.msra.mxu1 %v3582_v11 }
 0x15c   : > { %1964 = vmatpush.msra.mxu0 %v3593_v13  ;;  %1993 = vmatpush.msra.mxu1 %v3605_v15  ;;  %v1716_v15 = vld [vmem:[%s4005_s5 + $0x10] sm:$0xff] }
 0x15d   : > { %vm1724_vm3 = vcmp.gt.f32.partialorder %v1716_v15, 0.0 }
 0x15e   : > { %1965 = vmatpush.msra.mxu0 %v3610_v16  ;;  %1994 = vmatpush.msra.mxu1 %v3616_v17  ;;  %v1717_v16 = vld [vmem:[%s4005_s5 + $0x18] sm:$0xff] }
 0x15f   : > { %vm1725_vm4 = vcmp.gt.f32.partialorder %v1717_v16, 0.0 }
 0x160   : > { %1966 = vmatpush.msra.mxu0 %v3633_v20  ;;  %1995 = vmatpush.msra.mxu1 %v3628_v19 }
 0x162   : > { %1967 = vmatpush.msra.mxu0 %v3639_v21  ;;  %1996 = vmatpush.msra.mxu1 %v3651_v23 }
 0x164   : > { %1968 = vmatpush.msra.mxu0 %v3656_v24  ;;  %1997 = vmatpush.msra.mxu1 %v3662_v25 }
 0x166   : > { %1969 = vmatpush.msra.mxu0 %v3678_v27  ;;  %1998 = vmatpush.msra.mxu1 %v3673_v26  ;;  %v1718_v26 = vld [vmem:[%s4005_s5 + $0x20] sm:$0xff]  ;;  %v1719_v27 = vld [vmem:[%s4005_s5 + $0x28] sm:$0xff] }
 0x167   : > { %vm1726_vm5 = vcmp.gt.f32.partialorder %v1718_v26, 0.0  ;;  %vm1727_vm6 = vcmp.gt.f32.partialorder %v1719_v27, 0.0 }
 0x168   : > { %1970 = vmatpush.msra.mxu0 %v3683_v28  ;;  %1999 = vmatpush.msra.mxu1 %v3694_v29 }
 0x16a   : > { %1971 = vmatpush.msra.mxu0 %v3699_v30  ;;  %2000 = vmatpush.msra.mxu1 %v3704_v31 }
 0x16c   : > { %1972 = vmatpush.msra.mxu0 %v3724_v35  ;;  %2001 = vmatpush.msra.mxu1 %v3719_v34 }
 0x16e   : > { %1973 = vmatpush.msra.mxu0 %v3729_v36  ;;  %2002 = vmatpush.msra.mxu1 %v3747_v40  ;;  %v1720_v40 = vld [vmem:[%s4005_s5 + $0x30] sm:$0xff] }
 0x16f   : > { %vm1728_vm7 = vcmp.gt.f32.partialorder %v1720_v40, 0.0 }
 0x170   : > { %1974 = vmatpush.msra.mxu0 %v3752_v41  ;;  %2003 = vmatpush.msra.mxu1 %v3757_v42  ;;  %v1721_v41 = vld [vmem:[%s4005_s5 + $0x38] sm:$0xff]  ;;  %s1140_s5 = scalar_lea.vmem %s4347_s30, %s3541_s2  ;;  %s1191_s30 = scalar_lea.vmem %s4312_s22, %s4354_s3 }
 0x171   : > { %vm1729_vm8 = vcmp.gt.f32.partialorder %v1721_v41, 0.0  ;;  %v2081_v0 = vld [vmem:[%s1140_s5 + $0x18] sm:$0xff]  ;;  %v2080_v1 = vld [vmem:[%s1140_s5 + $0x10] sm:$0xff]  ;;  %v2078_v15 = vld [vmem:[%s1140_s5] sm:$0xff] }
 0x172   : > { %1975 = vmatpush.msra.mxu0 %v3775_v45  ;;  %2004 = vmatpush.msra.mxu1 %v3770_v44 }
 0x173   : > { %2110 = vmatpush.msrb.mxu2 %v2081_v0 }
 0x175   : > { %2111 = vmatpush.msrb.mxu2 %v2080_v1 }
 0x17e   : > { %v1665_v2 = vpop.f32.mrf.mxu2 }
 0x17f   : > { %v1694_v4 = vpop.f32.mrf.mxu3  ;;  %v1706_v5 = vmul.f32 0.5, %v1665_v2 }
 0x180   : > { %v1707_v6 = vmul.f32 0.5, %v1694_v4 }
 0x181   : > { %v1730_v11 = vsel %vm1722_vm1, %v1706_v5, -1e+30 }
 0x182   : > { %v1731_v12 = vsel %vm1723_vm2, %v1707_v6, -1e+30 }
 0x183   : > { %v1738_v13 = vmax.f32 %v1730_v11, %v1731_v12 }
 0x185   : > { %1739 = vmax.xlane.f32.xlu0 %v1738_v13 }
 0x186   : > { %v1668_v17 = vpop.f32.mrf.mxu2 }
 0x187   : > { %v1697_v19 = vpop.f32.mrf.mxu3  ;;  %v1708_v20 = vmul.f32 0.5, %v1668_v17 }
 0x188   : > { %v1709_v21 = vmul.f32 0.5, %v1697_v19 }
 0x189   : > { %v1732_v23 = vsel %vm1724_vm3, %v1708_v20, -1e+30 }
 0x18a   : > { %v1733_v24 = vsel %vm1725_vm4, %v1709_v21, -1e+30 }
 0x18b   : > { %v1741_v25 = vmax.f32 %v1732_v23, %v1733_v24 }
 0x18d   : > { %1742 = vmax.xlane.f32.xlu1 %v1741_v25 }
 0x18e   : > { %v1671_v28 = vpop.f32.mrf.mxu2 }
 0x18f   : > { %v1700_v29 = vpop.f32.mrf.mxu3  ;;  %v1710_v30 = vmul.f32 0.5, %v1671_v28 }
 0x190   : > { %v1711_v31 = vmul.f32 0.5, %v1700_v29 }
 0x191   : > { %v1734_v34 = vsel %vm1726_vm5, %v1710_v30, -1e+30 }
 0x192   : > { %v1735_v35 = vsel %vm1727_vm6, %v1711_v31, -1e+30 }
 0x193   : > { %v1744_v36 = vmax.f32 %v1734_v34, %v1735_v35 }
 0x195   : > { %1745 = vmax.xlane.f32.xlu2 %v1744_v36 }
 0x196   : > { %v1674_v42 = vpop.f32.mrf.mxu2 }
 0x197   : > { %v1703_v44 = vpop.f32.mrf.mxu3  ;;  %v1712_v45 = vmul.f32 0.5, %v1674_v42 }
 0x198   : > { %v1713_v43 = vmul.f32 0.5, %v1703_v44  ;;  %v2181_v44 = vld [vmem:[%s1156_s7 + $0x8] sm:$0xff] }
 0x199   : > { %v1736_v47 = vsel %vm1728_vm7, %v1712_v45, -1e+30 }
 0x19a   : > { %v1737_v38 = vsel %vm1729_vm8, %v1713_v43, -1e+30 }
 0x19b   : > { %v1747_v49 = vmax.f32 %v1736_v47, %v1737_v38 }
 0x19d   : > { %1748 = vmax.xlane.f32.xlu0 %v1747_v49 }
 0x1f8   : > { %v1740_v3 = vpop.xlane.xlu0 %1739 }
 0x1f9   : > { %v1750_v60 = vsub.f32 %v1730_v11, %v1740_v3  ;;  %v1751_v7 = vsub.f32 %v1731_v12, %v1740_v3  ;;  %v2079_v11 = vld [vmem:[%s1140_s5 + $0x8] sm:$0xff]  ;;  %s4043_s5 = scalar_lea.vmem %s4348_s11, %s3541_s2  ;;  %s4349_s11 = scalar_lea.vmem %s4346_s6, %s4354_s3 }
 0x1fa   : > { %2112 = vmatpush.msrb.mxu2 %v2079_v11  ;;  %v2134_v40 = vld [vmem:[%s4043_s5 + $0x18] sm:$0xff] }
 0x1fb   : > { %v1758_v61 = vmul.f32 1.442695, %v1750_v60  ;;  %v1760_v8 = vmul.f32 1.442695, %v1751_v7  ;;  %2163 = vmatpush.msrb.mxu3 %v2134_v40  ;;  %v2180_v60 = vld [vmem:[%s1156_s7] sm:$0xff]  ;;  %v2222_v40 = vld [vmem:[%s4067_s0 + $0x8] sm:$0xff] }
 0x1fc   : > { %2113 = vmatpush.msrb.mxu2 %v2078_v15 }
 0x1fd   : > { %3302 = vpow2.f32 %v1758_v61 }
 0x1fe   : > { %3304 = vpow2.f32 %v1760_v8 }
 0x200   : > { %v1743_v50 = vpop.xlane.xlu1 %1742 }
 0x201   : > { %v1752_v18 = vsub.f32 %v1732_v23, %v1743_v50  ;;  %v1753_v52 = vsub.f32 %v1733_v24, %v1743_v50 }
 0x203   : > { %v3303_v53 = vpop.eup %3302  ;;  %v1762_v59 = vmul.f32 1.442695, %v1752_v18  ;;  %v1764_v10 = vmul.f32 1.442695, %v1753_v52 }
 0x204   : > { %v3305_v62 = vpop.eup %3304  ;;  %1918 = vmatmul.f32.vlgmr.msrb.gmra.mxu0 %v3303_v53 }
 0x205   : > { %3306 = vpow2.f32 %v1762_v59  ;;  %1947 = vmatmul.f32.vlgmr.msrb.gmra.mxu1 %v3305_v62 }
 0x206   : > { %3308 = vpow2.f32 %v1764_v10 }
 0x208   : > { %v1746_v63 = vpop.xlane.xlu2 %1745 }
 0x209   : > { %v1754_v9 = vsub.f32 %v1734_v34, %v1746_v63  ;;  %v1755_v32 = vsub.f32 %v1735_v35, %v1746_v63  ;;  %v2183_v34 = vld [vmem:[%s1156_s7 + $0x18] sm:$0xff]  ;;  %v2182_v35 = vld [vmem:[%s1156_s7 + $0x10] sm:$0xff]  ;;  %s1159_s7 = scalar_lea.vmem %s4304_s14, %s4354_s3 }
 0x20a   : > { %2200 = vmatpush.msrb.mxu0 %v2183_v34 }
 0x20b   : > { %v3307_v33 = vpop.eup %3306  ;;  %v1766_v37 = vmul.f32 1.442695, %v1754_v9  ;;  %v1768_v14 = vmul.f32 1.442695, %v1755_v32 }
 0x20c   : > { %v3309_v39 = vpop.eup %3308  ;;  %1921 = vmatmul.f32.gmra.mxu0 %v3307_v33 }
 0x20d   : > { %3310 = vpow2.f32 %v1766_v37  ;;  %1950 = vmatmul.f32.gmra.mxu1 %v3309_v39  ;;  %2201 = vmatpush.msrb.mxu0 %v2182_v35  ;;  %v2224_v35 = vld [vmem:[%s4067_s0 + $0x18] sm:$0xff] }
 0x20e   : > { %3312 = vpow2.f32 %v1768_v14 }
 0x20f   : > { %2202 = vmatpush.msrb.mxu0 %v2181_v44  ;;  %v3359_v44 = vld [vmem:[%s3741_s27 + $0x8] sm:$0xff] }
 0x210   : > { %v1749_v57 = vpop.xlane.xlu0 %1748 }
 0x211   : > { %v1756_v51 = vsub.f32 %v1736_v47, %v1749_v57  ;;  %v1757_v54 = vsub.f32 %v1737_v38, %v1749_v57  ;;  %2203 = vmatpush.msrb.mxu0 %v2180_v60 }
 0x213   : > { %v3311_v46 = vpop.eup %3310  ;;  %v1770_v58 = vmul.f32 1.442695, %v1756_v51  ;;  %v1772_v22 = vmul.f32 1.442695, %v1757_v54 }
 0x214   : > { %v3313_v55 = vpop.eup %3312  ;;  %1924 = vmatmul.f32.gmra.mxu0 %v3311_v46 }
 0x215   : > { %3314 = vpow2.f32 %v1770_v58  ;;  %1953 = vmatmul.f32.gmra.mxu1 %v3313_v55 }
 0x216   : > { %3316 = vpow2.f32 %v1772_v22 }
 0x21b   : > { %v3315_v56 = vpop.eup %3314 }
 0x21c   : > { %v3317_v48 = vpop.eup %3316  ;;  %1927 = vmatmul.f32.gmra.mxu0 %v3315_v56 }
 0x21d   : > { %1956 = vmatmul.f32.gmra.mxu1 %v3317_v48 }
 0x224   : > { %1976 = vmatmul.f32.vlgmr.msra.gmra.mxu0 %v3303_v53 }
 0x225   : > { %2005 = vmatmul.f32.vlgmr.msra.gmra.mxu1 %v3305_v62 }
 0x22c   : > { %1979 = vmatmul.f32.gmra.mxu0 %v3307_v33 }
 0x22d   : > { %2008 = vmatmul.f32.gmra.mxu1 %v3309_v39 }
 0x234   : > { %1982 = vmatmul.f32.gmra.mxu0 %v3311_v46 }
 0x235   : > { %2011 = vmatmul.f32.gmra.mxu1 %v3313_v55 }
 0x23c   : > { %1985 = vmatmul.f32.gmra.mxu0 %v3315_v56 }
 0x23d   : > { %2014 = vmatmul.f32.gmra.mxu1 %v3317_v48 }
 0x281   : > { %v1919_v2 = vpop.f32.mrf.mxu0 }
 0x282   : > { %v1948_v4 = vpop.f32.mrf.mxu1 }
 0x283   : > { %v1949_v38 = vadd.f32 %v1948_v4, %v1919_v2 }
 0x289   : > { %v4023_v5 = vpop.f32.mrf.mxu0 }
 0x28a   : > { %v4025_v6 = vpop.f32.mrf.mxu1 }
 0x28b   : > { %v1952_v32 = vadd.f32 %v4025_v6, %v4023_v5 }
 0x291   : > { %v4027_v12 = vpop.f32.mrf.mxu0 }
 0x292   : > { %v4029_v13 = vpop.f32.mrf.mxu1 }
 0x293   : > { %v1955_v56 = vadd.f32 %v4029_v13, %v4027_v12 }
 0x299   : > { %v4031_v16 = vpop.f32.mrf.mxu0 }
 0x29a   : > { %v4033_v17 = vpop.f32.mrf.mxu1 }
 0x29b   : > { %v1958_v13 = vadd.f32 %v4033_v17, %v4031_v16  ;;  %v3294_v16 = vld [vmem:[%s4349_s11] ss:$0 sm:$0xff]  ;;  %v2228_v17 = vld [vmem:[%s4067_s0 + $0x38] sm:$0xff]  ;;  %s4106_s11 = scalar_lea.vmem %s4307_s17, %s3999_s1 }
 0x29c   : > { %2254 = vmatpush.msrb.mxu1 %v2228_v17 }
 0x2a1   : > { %v1977_v19 = vpop.f32.mrf.mxu0 }
 0x2a2   : > { %v2006_v20 = vpop.f32.mrf.mxu1 }
 0x2a3   : > { %v2007_v21 = vadd.f32 %v2006_v20, %v1977_v19 }
 0x2a5   : > { %3318 = vrcp.f32 %v2007_v21  ;;  %v2029_v29 = vand.u32 2147483648, %v2007_v21  ;;  %v2027_v31 = vand.u32 2147483647, %v2007_v21  ;;  %vm2023_vm10 = vweird.f32 %v2007_v21 }
 0x2a7   : > { %v2030_v47 = vor.u32 1.1754944e-38, %v2029_v29  ;;  %vm2028_vm12 = vcmp.eq.f32.partialorder %v2027_v31, 8.507059e+37  ;;  %v3358_v31 = vld [vmem:[%s3741_s27] sm:$0xff] }
 0x2a9   : > { %v1980_v23 = vpop.f32.mrf.mxu0 }
 0x2aa   : > { %v2009_v24 = vpop.f32.mrf.mxu1 }
 0x2ab   : > { %v3319_v25 = vpop.eup %3318  ;;  %v2010_v26 = vadd.f32 %v2009_v24, %v1980_v23  ;;  %v2133_v23 = vld [vmem:[%s4043_s5 + $0x10] sm:$0xff]  ;;  %v2132_v24 = vld [vmem:[%s4043_s5 + $0x8] sm:$0xff] }
 0x2ac   : > { %v2019_v27 = vmul.f32 %v3319_v25, %v2007_v21  ;;  %vm2024_vm9 = vweird.f32 %v3319_v25  ;;  %2164 = vmatpush.msrb.mxu3 %v2133_v23 }
 0x2ad   : > { %3320 = vrcp.f32 %v2010_v26  ;;  %vm2025_vm11 = vmor %vm2023_vm10, %vm2024_vm9  ;;  %v2044_v50 = vand.u32 2147483648, %v2010_v26  ;;  %v2042_v52 = vand.u32 2147483647, %v2010_v26  ;;  %vm2038_vm14 = vweird.f32 %v2010_v26 }
 0x2ae   : > { %v2020_v28 = vsub.f32 1.0, %v2019_v27  ;;  %2165 = vmatpush.msrb.mxu3 %v2132_v24  ;;  %v2226_v27 = vld [vmem:[%s4067_s0 + $0x28] sm:$0xff] }
 0x2af   : > { %v2045_v9 = vor.u32 1.1754944e-38, %v2044_v50  ;;  %vm2043_vm1 = vcmp.eq.f32.partialorder %v2042_v52, 8.507059e+37  ;;  %v3295_v50 = vld [vmem:[%s1159_s7] ss:$0 sm:$0xff]  ;;  %v2285_v52 = vld [vmem:[%s4106_s11 + $0x30] sm:$0xff]  ;;  %s1175_s7 = scalar_lea.vmem %s4308_s18, %s4354_s3 }
 0x2b0   : > { %v2021_v30 = vmul.f32 %v3319_v25, %v2020_v28 }
 0x2b1   : > { %v1983_v36 = vpop.f32.mrf.mxu0 }
 0x2b2   : > { %v2012_v41 = vpop.f32.mrf.mxu1  ;;  %v2022_v42 = vadd.f32 %v3319_v25, %v2021_v30  ;;  %v2225_v30 = vld [vmem:[%s4067_s0 + $0x20] sm:$0xff] }
 0x2b3   : > { %v3321_v45 = vpop.eup %3320  ;;  %v2013_v43 = vadd.f32 %v2012_v41, %v1983_v36  ;;  %v2223_v36 = vld [vmem:[%s4067_s0 + $0x10] sm:$0xff] }
 0x2b4   : > { %v2034_v49 = vmul.f32 %v3321_v45, %v2010_v26  ;;  %v2026_v3 = vsel %vm2025_vm11, %v3319_v25, %v2022_v42  ;;  %vm2039_vm13 = vweird.f32 %v3321_v45  ;;  %v2131_v25 = vld [vmem:[%s4043_s5] sm:$0xff]  ;;  %v2227_v26 = vld [vmem:[%s4067_s0 + $0x30] sm:$0xff] }
 0x2b5   : > { %3322 = vrcp.f32 %v2013_v43  ;;  %v2031_v7 = vsel %vm2028_vm12, %v2030_v47, %v2026_v3  ;;  %vm2040_vm15 = vmor %vm2038_vm14, %vm2039_vm13  ;;  %v2059_v51 = vand.u32 2147483648, %v2013_v43  ;;  %v2057_v46 = vand.u32 2147483647, %v2013_v43  ;;  %2166 = vmatpush.msrb.mxu3 %v2131_v25  ;;  %2255 = vmatpush.msrb.mxu1 %v2227_v26  ;;  %v2336_v26 = vld [vmem:[%s4133_s28] sm:$0xff] }
 0x2b6   : > { %v2035_v61 = vsub.f32 1.0, %v2034_v49  ;;  %v2032_v8 = vmul.f32 %v2031_v7, %v1949_v38  ;;  %vm2053_vm3 = vweird.f32 %v2013_v43  ;;  %v3360_v38 = vld [vmem:[%s3741_s27 + $0x10] sm:$0xff]  ;;  %v3361_v7 = vld [vmem:[%s3741_s27 + $0x18] sm:$0xff]  ;;  %s4195_s27 = scalar_lea.vmem %s4313_s23, %s3999_s1 }
 0x2b7   : > { %v2060_v55 = vor.u32 1.1754944e-38, %v2059_v51  ;;  %vm2058_vm5 = vcmp.eq.f32.partialorder %v2057_v46, 8.507059e+37  ;;  %2256 = vmatpush.msrb.mxu1 %v2226_v27  ;;  %v3298_v27 = vld [vmem:[%s1175_s7] ss:$0 sm:$0xff] }
 0x2b8   : > { %3141 = vmatmul.msk.f32.vlgmr.msrb.gmra.mxu2 %vm1225_vm0, %v2032_v8  ;;  %v2036_v18 = vmul.f32 %v3321_v45, %v2035_v61  ;;  %v2221_v8 = vld [vmem:[%s4067_s0] sm:$0xff] }
 0x2b9   : > { %v1986_v53 = vpop.f32.mrf.mxu0  ;;  %2257 = vmatpush.msrb.mxu1 %v2225_v30  ;;  %v2398_v30 = vld [vmem:[%s4160_s4 + $0x28] sm:$0xff] }
 0x2ba   : > { %v2015_v59 = vpop.f32.mrf.mxu1  ;;  %v2037_v10 = vadd.f32 %v3321_v45, %v2036_v18  ;;  %v2286_v18 = vld [vmem:[%s4106_s11 + $0x38] sm:$0xff] }
 0x2bb   : > { %v3323_v62 = vpop.eup %3322  ;;  %v2016_v63 = vadd.f32 %v2015_v59, %v1986_v53  ;;  %2258 = vmatpush.msrb.mxu1 %v2224_v35  ;;  %2311 = vmatpush.msra.mxu2 %v2286_v18  ;;  %v2397_v35 = vld [vmem:[%s4160_s4 + $0x20] sm:$0xff] }
 0x2bc   : > { %v2049_v33 = vmul.f32 %v3323_v62, %v2013_v43  ;;  %v2041_v37 = vsel %vm2040_vm15, %v3321_v45, %v2037_v10  ;;  %vm2054_vm2 = vweird.f32 %v3323_v62  ;;  %v2284_v10 = vld [vmem:[%s4106_s11 + $0x28] sm:$0xff] }
 0x2bd   : > { %3324 = vrcp.f32 %v2016_v63  ;;  %v2046_v14 = vsel %vm2043_vm1, %v2045_v9, %v2041_v37  ;;  %vm2055_vm4 = vmor %vm2053_vm3, %vm2054_vm2  ;;  %v2074_v5 = vand.u32 2147483648, %v2016_v63  ;;  %v2072_v11 = vand.u32 2147483647, %v2016_v63  ;;  %2259 = vmatpush.msrb.mxu1 %v2223_v36  ;;  %2312 = vmatpush.msra.mxu2 %v2285_v52  ;;  %v2282_v9 = vld [vmem:[%s4106_s11 + $0x18] sm:$0xff] }
 0x2be   : > { %v2050_v39 = vsub.f32 1.0, %v2049_v33  ;;  %v2047_v57 = vmul.f32 %v2046_v14, %v1952_v32  ;;  %vm2068_vm7 = vweird.f32 %v2016_v63  ;;  %v2281_v32 = vld [vmem:[%s4106_s11 + $0x10] sm:$0xff]  ;;  %v2280_v14 = vld [vmem:[%s4106_s11 + $0x8] sm:$0xff] }
 0x2bf   : > { %v2075_v12 = vor.u32 1.1754944e-38, %v2074_v5  ;;  %vm2073_vm9 = vcmp.eq.f32.partialorder %v2072_v11, 8.507059e+37  ;;  %2260 = vmatpush.msrb.mxu1 %v2222_v40  ;;  %2313 = vmatpush.msra.mxu2 %v2284_v10  ;;  %v2340_v5 = vld [vmem:[%s4133_s28 + $0x20] sm:$0xff]  ;;  %v2339_v11 = vld [vmem:[%s4133_s28 + $0x18] sm:$0xff]  ;;  %v2456_v10 = vld [vmem:[%s4195_s27 + $0x30] sm:$0xff] }
 0x2c0   : > { %3142 = vmatmul.msk.f32.gmra.mxu2 %vm1225_vm0, %v2047_v57  ;;  %v2051_v54 = vmul.f32 %v3323_v62, %v2050_v39  ;;  %v2396_v40 = vld [vmem:[%s4160_s4 + $0x18] sm:$0xff] }
 0x2c1   : > { %2261 = vmatpush.msrb.mxu1 %v2221_v8  ;;  %v2393_v8 = vld [vmem:[%s4160_s4] sm:$0xff] }
 0x2c2   : > { %v2052_v58 = vadd.f32 %v3323_v62, %v2051_v54 }
 0x2c3   : > { %v3325_v22 = vpop.eup %3324 }
 0x2c4   : > { %v2064_v48 = vmul.f32 %v3325_v22, %v2016_v63  ;;  %v2056_v0 = vsel %vm2055_vm4, %v3323_v62, %v2052_v58  ;;  %vm2069_vm6 = vweird.f32 %v3325_v22  ;;  %v2283_v63 = vld [vmem:[%s4106_s11 + $0x20] sm:$0xff] }
 0x2c5   : > { %v2061_v1 = vsel %vm2058_vm5, %v2060_v55, %v2056_v0  ;;  %vm2070_vm8 = vmor %vm2068_vm7, %vm2069_vm6  ;;  %2314 = vmatpush.msra.mxu2 %v2283_v63  ;;  %v2279_v55 = vld [vmem:[%s4106_s11] sm:$0xff]  ;;  %v2342_v0 = vld [vmem:[%s4133_s28 + $0x30] sm:$0xff]  ;;  %s4272_s11 = scalar_lea.vmem %s4316_s26, %s3541_s2 }
 0x2c6   : > { %v2065_v2 = vsub.f32 1.0, %v2064_v48  ;;  %v2062_v4 = vmul.f32 %v2061_v1, %v1955_v56  ;;  %v3297_v56 = vld [vmem:[%s1167_s10] ss:$0 sm:$0xff]  ;;  %v2343_v48 = vld [vmem:[%s4133_s28 + $0x38] sm:$0xff]  ;;  %v2341_v1 = vld [vmem:[%s4133_s28 + $0x28] sm:$0xff]  ;;  %s1199_s10 = scalar_lea.vmem %s4314_s24, %s4354_s3 }
 0x2c7   : > { %2315 = vmatpush.msra.mxu2 %v2282_v9  ;;  %2368 = vmatpush.msra.mxu3 %v2343_v48 }
 0x2c8   : > { %3143 = vmatmul.msk.f32.gmra.mxu2 %vm1225_vm0, %v2062_v4  ;;  %v2066_v6 = vmul.f32 %v3325_v22, %v2065_v2 }
 0x2c9   : > { %2316 = vmatpush.msra.mxu2 %v2281_v32  ;;  %2369 = vmatpush.msra.mxu3 %v2342_v0  ;;  %v2454_v32 = vld [vmem:[%s4195_s27 + $0x20] sm:$0xff] }
 0x2ca   : > { %v2067_v15 = vadd.f32 %v3325_v22, %v2066_v6 }
 0x2cb   : > { %2317 = vmatpush.msra.mxu2 %v2280_v14  ;;  %2370 = vmatpush.msra.mxu3 %v2341_v1  ;;  %v2452_v14 = vld [vmem:[%s4195_s27 + $0x10] sm:$0xff] }
 0x2cc   : > { %v2071_v19 = vsel %vm2070_vm8, %v3325_v22, %v2067_v15  ;;  %v2338_v15 = vld [vmem:[%s4133_s28 + $0x10] sm:$0xff] }
 0x2cd   : > { %v2076_v20 = vsel %vm2073_vm9, %v2075_v12, %v2071_v19  ;;  %2318 = vmatpush.msra.mxu2 %v2279_v55  ;;  %2371 = vmatpush.msra.mxu3 %v2340_v5  ;;  %v2337_v12 = vld [vmem:[%s4133_s28 + $0x8] sm:$0xff]  ;;  %s4351_s28 = scalar_lea.vmem %s4302_s12, %s4354_s3 }
 0x2ce   : > { %v2077_v21 = vmul.f32 %v2076_v20, %v1958_v13 }
 0x2cf   : > { %2372 = vmatpush.msra.mxu3 %v2339_v11 }
 0x2d0   : > { %3144 = vmatmul.msk.f32.gmra.mxu2 %vm1225_vm0, %v2077_v21 }
 0x2d1   : > { %2373 = vmatpush.msra.mxu3 %v2338_v15 }
 0x2d3   : > { %2374 = vmatpush.msra.mxu3 %v2337_v12 }
 0x2d5   : > { %2375 = vmatpush.msra.mxu3 %v2336_v26 }
 0x33b   : > { %v2115_v28 = vpop.f32.mrf.mxu2 }
 0x33c   : > { %v2116_v29 = vadd.f32 %v3294_v16, %v2115_v28  ;;  %v2400_v28 = vld [vmem:[%s4160_s4 + $0x38] sm:$0xff] }
 0x33d   : > { %2425 = vmatpush.msra.mxu0 %v2400_v28 }
 0x33e   : > { %v2127_v34 = vadd.f32 %v3358_v31, %v2116_v29  ;;  %v2399_v29 = vld [vmem:[%s4160_s4 + $0x30] sm:$0xff] }
 0x33f   : > { %2426 = vmatpush.msra.mxu0 %v2399_v29 }
 0x340   : > { %3145 = vmatmul.msk.f32.vlgmr.msrb.gmra.mxu3 %vm1225_vm0, %v2127_v34  ;;  %3149 = vmatmul.msk.f32.vlgmr.msrb.gmra.mxu0 %vm1225_vm0, %v2127_v34 }
 0x341   : > { %2427 = vmatpush.msra.mxu0 %v2398_v30 }
 0x343   : > { %v2118_v41 = vpop.f32.mrf.mxu2  ;;  %2428 = vmatpush.msra.mxu0 %v2397_v35 }
 0x344   : > { %v2119_v42 = vadd.f32 %v3294_v16, %v2118_v41  ;;  %v2395_v41 = vld [vmem:[%s4160_s4 + $0x10] sm:$0xff] }
 0x345   : > { %2429 = vmatpush.msra.mxu0 %v2396_v40 }
 0x346   : > { %v2128_v45 = vadd.f32 %v3359_v44, %v2119_v42  ;;  %v2394_v42 = vld [vmem:[%s4160_s4 + $0x8] sm:$0xff]  ;;  %s4350_s4 = sld [smem:[#allocation5_spill]] }
 0x347   : > { %2430 = vmatpush.msra.mxu0 %v2395_v41 }
 0x348   : > { %3146 = vmatmul.msk.f32.gmra.mxu3 %vm1225_vm0, %v2128_v45  ;;  %3150 = vmatmul.msk.f32.gmra.mxu0 %vm1225_vm0, %v2128_v45 }
 0x349   : > { %2431 = vmatpush.msra.mxu0 %v2394_v42 }
 0x34b   : > { %v2121_v43 = vpop.f32.mrf.mxu2  ;;  %2432 = vmatpush.msra.mxu0 %v2393_v8  ;;  %v2450_v8 = vld [vmem:[%s4195_s27] sm:$0xff] }
 0x34c   : > { %v2122_v47 = vadd.f32 %v3294_v16, %v2121_v43  ;;  %s4217_s9 = scalar_lea.vmem %s4350_s4, %s3541_s2 }
 0x34d   : > { %v2504_v0 = vld [vmem:[%s4217_s9 + $0x8] sm:$0xff]  ;;  %v2503_v1 = vld [vmem:[%s4217_s9] sm:$0xff] }
 0x34e   : > { %v2129_v49 = vadd.f32 %v3360_v38, %v2122_v47 }
 0x350   : > { %3147 = vmatmul.msk.f32.gmra.mxu3 %vm1225_vm0, %v2129_v49  ;;  %3151 = vmatmul.msk.f32.gmra.mxu0 %vm1225_vm0, %v2129_v49 }
 0x353   : > { %v2124_v3 = vpop.f32.mrf.mxu2 }
 0x354   : > { %v2125_v60 = vadd.f32 %v3294_v16, %v2124_v3 }
 0x356   : > { %v2130_v61 = vadd.f32 %v3361_v7, %v2125_v60 }
 0x358   : > { %3148 = vmatmul.msk.f32.gmra.mxu3 %vm1225_vm0, %v2130_v61  ;;  %3152 = vmatmul.msk.f32.gmra.mxu0 %vm1225_vm0, %v2130_v61  ;;  %vm2233_vm0 = vcmask 523264  }
 0x3bd   : > { %v2205_v53 = vpop.f32.mrf.mxu0 }
 0x3be   : > { %v2206_v59 = vadd.f32 %v3295_v50, %v2205_v53  ;;  %v3299_v53 = vld [vmem:[%s1183_s8] ss:$0 sm:$0xff] }
 0x3c0   : > { %v2217_v62 = vmax.f32 %v2206_v59, 0.0  ;;  %v2457_v59 = vld [vmem:[%s4195_s27 + $0x38] sm:$0xff] }
 0x3c1   : > { %2482 = vmatpush.msra.mxu1 %v2457_v59 }
 0x3c2   : > { %3153 = vmatmul.msk.f32.vlgmr.msrb.gmra.mxu1 %vm2233_vm0, %v2217_v62  ;;  %v2455_v62 = vld [vmem:[%s4195_s27 + $0x28] sm:$0xff] }
 0x3c3   : > { %v4182_v61 = vpop.f32.mrf.mxu3  ;;  %2483 = vmatpush.msra.mxu1 %v2456_v10 }
 0x3c5   : > { %v2208_v33 = vpop.f32.mrf.mxu0  ;;  %2484 = vmatpush.msra.mxu1 %v2455_v62 }
 0x3c6   : > { %v2209_v37 = vadd.f32 %v3295_v50, %v2208_v33 }
 0x3c7   : > { %2485 = vmatpush.msra.mxu1 %v2454_v32 }
 0x3c8   : > { %v2218_v39 = vmax.f32 %v2209_v37, 0.0  ;;  %v2453_v37 = vld [vmem:[%s4195_s27 + $0x18] sm:$0xff] }
 0x3c9   : > { %2486 = vmatpush.msra.mxu1 %v2453_v37 }
 0x3ca   : > { %3154 = vmatmul.msk.f32.gmra.mxu1 %vm2233_vm0, %v2218_v39  ;;  %v2451_v39 = vld [vmem:[%s4195_s27 + $0x8] sm:$0xff] }
 0x3cb   : > { %2487 = vmatpush.msra.mxu1 %v2452_v14 }
 0x3cd   : > { %v2211_v57 = vpop.f32.mrf.mxu0  ;;  %2488 = vmatpush.msra.mxu1 %v2451_v39 }
 0x3ce   : > { %v2212_v51 = vadd.f32 %v3295_v50, %v2211_v57 }
 0x3cf   : > { %2489 = vmatpush.msra.mxu1 %v2450_v8 }
 0x3d0   : > { %v2219_v54 = vmax.f32 %v2212_v51, 0.0 }
 0x3d2   : > { %3155 = vmatmul.msk.f32.gmra.mxu1 %vm2233_vm0, %v2219_v54 }
 0x3d5   : > { %v2214_v46 = vpop.f32.mrf.mxu0 }
 0x3d6   : > { %v2215_v58 = vadd.f32 %v3295_v50, %v2214_v46  ;;  %v4185_v50 = vpop.f32.mrf.mxu3 }
 0x3d8   : > { %v2220_v22 = vmax.f32 %v2215_v58, 0.0 }
 0x3da   : > { %3156 = vmatmul.msk.f32.gmra.mxu1 %vm2233_vm0, %v2220_v22 }
 0x3de   : > { %v4187_v18 = vpop.f32.mrf.mxu3 }
 0x3e6   : > { %v4189_v52 = vpop.f32.mrf.mxu3 }
 0x43f   : > { %v2263_v2 = vpop.f32.mrf.mxu1 }
 0x440   : > { %v2264_v4 = vadd.f32 %v3297_v56, %v2263_v2  ;;  %v2508_v2 = vmax.f32 %v2504_v0, 0.0 }
 0x442   : > { %v2275_v6 = vmax.f32 %v2264_v4, 0.0  ;;  %v2507_v4 = vmax.f32 %v2503_v1, 0.0  ;;  %v2512_v5 = vmin.f32 %v2508_v2, 1.0 }
 0x444   : > { %3157 = vmatmul.msk.f32.vlgmr.msra.gmra.mxu2 %vm2233_vm0, %v2275_v6  ;;  %v2511_v6 = vmin.f32 %v2507_v4, 1.0  ;;  %v2520_v11 = vsub.f32 1.0, %v2512_v5 }
 0x446   : > { %v2519_v15 = vsub.f32 1.0, %v2511_v6  ;;  %v2524_v12 = vmax.f32 %v2520_v11, 1e-05 }
 0x447   : > { %v2266_v13 = vpop.f32.mrf.mxu1 }
 0x448   : > { %v2267_v19 = vadd.f32 %v3297_v56, %v2266_v13  ;;  %v2523_v13 = vmax.f32 %v2519_v15, 1e-05  ;;  %3326 = vrcp.f32 %v2524_v12  ;;  %v2553_v30 = vand.u32 2147483648, %v2524_v12 }
 0x449   : > { %vm2547_vm10 = vweird.f32 %v2524_v12 }
 0x44a   : > { %v2276_v20 = vmax.f32 %v2267_v19, 0.0  ;;  %v2506_v19 = vld [vmem:[%s4217_s9 + $0x18] sm:$0xff]  ;;  %3328 = vrcp.f32 %v2523_v13  ;;  %v2554_v41 = vor.u32 1.1754944e-38, %v2553_v30  ;;  %vm2532_vm13 = vweird.f32 %v2523_v13 }
 0x44c   : > { %3158 = vmatmul.msk.f32.gmra.mxu2 %vm2233_vm0, %v2276_v20  ;;  %v2510_v20 = vmax.f32 %v2506_v19, 0.0 }
 0x44f   : > { %v2269_v21 = vpop.f32.mrf.mxu1 }
 0x450   : > { %v2270_v23 = vadd.f32 %v3297_v56, %v2269_v21  ;;  %v4222_v21 = vmin.f32 %v2510_v20, 1.0 }
 0x452   : > { %v2277_v24 = vmax.f32 %v2270_v23, 0.0  ;;  %v2522_v23 = vsub.f32 1.0, %v4222_v21  ;;  %v2518_v37 = vmax.f32 %v4222_v21, 1e-05 }
 0x454   : > { %3159 = vmatmul.msk.f32.gmra.mxu2 %vm2233_vm0, %v2277_v24  ;;  %v3327_v24 = vpop.eup %3326 }
 0x455   : > { %vm2548_vm11 = vweird.f32 %v3327_v24 }
 0x456   : > { %vm2549_vm12 = vmor %vm2547_vm10, %vm2548_vm11 }
 0x457   : > { %v2272_v25 = vpop.f32.mrf.mxu1 }
 0x458   : > { %v2273_v16 = vadd.f32 %v3297_v56, %v2272_v25  ;;  %v2526_v25 = vmax.f32 %v2522_v23, 1e-05 }
 0x45a   : > { %v2278_v17 = vmax.f32 %v2273_v16, 0.0  ;;  %v3329_v16 = vpop.eup %3328  ;;  %3330 = vrcp.f32 %v2526_v25  ;;  %v2583_v62 = vand.u32 2147483648, %v2526_v25  ;;  %vm2577_vm3 = vweird.f32 %v2526_v25 }
 0x45b   : > { %v2528_v26 = vmul.f32 %v3329_v16, %v2523_v13  ;;  %vm2533_vm14 = vweird.f32 %v3329_v16  ;;  %v2581_v32 = vand.u32 2147483647, %v2526_v25 }
 0x45c   : > { %3160 = vmatmul.msk.f32.gmra.mxu2 %vm2233_vm0, %v2278_v17  ;;  %v2543_v17 = vmul.f32 %v3327_v24, %v2524_v12  ;;  %vm2534_vm1 = vmor %vm2532_vm13, %vm2533_vm14 }
 0x45d   : > { %v2529_v28 = vsub.f32 1.0, %v2528_v26  ;;  %vm2582_vm6 = vcmp.eq.f32.partialorder %v2581_v32, 8.507059e+37 }
 0x460   : > { %v3331_v40 = vpop.eup %3330 }
 0x461   : > { %vm2578_vm4 = vweird.f32 %v3331_v40 }
 0x462   : > { %vm2579_vm5 = vmor %vm2577_vm3, %vm2578_vm4 }
 0x4c7   : > { %v2320_v31 = vpop.f32.mrf.mxu2 }
 0x4c8   : > { %v2321_v34 = vadd.f32 %v3298_v27, %v2320_v31  ;;  %v2530_v31 = vmul.f32 %v3329_v16, %v2529_v28 }
 0x4ca   : > { %v2332_v36 = vmax.f32 %v2321_v34, 0.0  ;;  %v2538_v34 = vand.u32 2147483648, %v2523_v13  ;;  %v2531_v42 = vadd.f32 %v3329_v16, %v2530_v31 }
 0x4cc   : > { %3161 = vmatmul.msk.f32.vlgmr.msra.gmra.mxu3 %vm2233_vm0, %v2332_v36  ;;  %v2551_v36 = vand.u32 2147483647, %v2524_v12 }
 0x4ce   : > { %vm2552_vm15 = vcmp.eq.f32.partialorder %v2551_v36, 8.507059e+37 }
 0x4cf   : > { %v2323_v44 = vpop.f32.mrf.mxu2 }
 0x4d0   : > { %v2324_v45 = vadd.f32 %v3298_v27, %v2323_v44  ;;  %v2516_v44 = vmax.f32 %v2512_v5, 1e-05  ;;  %v3373_v5 = vmov 1  }
 0x4d2   : > { %v2333_v43 = vmax.f32 %v2324_v45, 0.0 }
 0x4d4   : > { %3162 = vmatmul.msk.f32.gmra.mxu3 %vm2233_vm0, %v2333_v43  ;;  %v2515_v43 = vmax.f32 %v2511_v6, 1e-05  ;;  %v3300_v6 = vld [vmem:[%s1191_s30] ss:$0 sm:$0xff]  ;;  %s3090_s30 = sshll.u32 %s4354_s3, 2 }
 0x4d5   : > { %s1203_s1 = scalar_lea.vmem %s4315_s25, %s3090_s30 }
 0x4d7   : > { %v2326_v47 = vpop.f32.mrf.mxu2 }
 0x4d8   : > { %v2327_v38 = vadd.f32 %v3298_v27, %v2326_v47 }
 0x4da   : > { %v2334_v49 = vmax.f32 %v2327_v38, 0.0  ;;  %v2535_v38 = vsel %vm2534_vm1, %v3329_v16, %v2531_v42 }
 0x4dc   : > { %3163 = vmatmul.msk.f32.gmra.mxu3 %vm2233_vm0, %v2334_v49  ;;  %v2536_v49 = vand.u32 2147483647, %v2523_v13 }
 0x4de   : > { %vm2537_vm2 = vcmp.eq.f32.partialorder %v2536_v49, 8.507059e+37 }
 0x4df   : > { %v2329_v3 = vpop.f32.mrf.mxu2 }
 0x4e0   : > { %v2330_v60 = vadd.f32 %v3298_v27, %v2329_v3  ;;  %v2544_v27 = vsub.f32 1.0, %v2543_v17  ;;  %v2539_v3 = vor.u32 1.1754944e-38, %v2538_v34 }
 0x4e2   : > { %v2335_v7 = vmax.f32 %v2330_v60, 0.0  ;;  %v2545_v29 = vmul.f32 %v3327_v24, %v2544_v27 }
 0x4e4   : > { %3164 = vmatmul.msk.f32.gmra.mxu3 %vm2233_vm0, %v2335_v7  ;;  %v2546_v35 = vadd.f32 %v3327_v24, %v2545_v29  ;;  %v2573_v7 = vmul.f32 %v3331_v40, %v2526_v25 }
 0x4e6   : > { %v2550_v45 = vsel %vm2549_vm12, %v3327_v24, %v2546_v35  ;;  %v2574_v59 = vsub.f32 1.0, %v2573_v7 }
 0x4e7   : > { %v2555_v47 = vsel %vm2552_vm15, %v2554_v41, %v2550_v45 }
 0x4e8   : > { %v2556_v60 = vmul.f32 %v2555_v47, %v2516_v44 }
 0x4ea   : > { %3332 = vlog2.f32 %v2556_v60  ;;  %v3301_v60 = vld [vmem:[%s1199_s10] ss:$0 sm:$0xff] }
 0x4f0   : > { %v3333_v39 = vpop.eup %3332 }
 0x54f   : > { %v2377_v63 = vpop.f32.mrf.mxu3 }
 0x550   : > { %v2378_v9 = vadd.f32 %v3299_v53, %v2377_v63  ;;  %v2575_v63 = vmul.f32 %v3331_v40, %v2574_v59 }
 0x552   : > { %v2389_v33 = vmax.f32 %v2378_v9, 0.0  ;;  %v3372_v9 = vmov 0   ;;  %v2576_v14 = vadd.f32 %v3331_v40, %v2575_v63 }
 0x553   : > { %3287 = vset.pattern.permute.xlu1 %v3372_v9  ;;  %3286 = vset.pattern.permute.xlu0 %v3372_v9 }
 0x554   : > { %3165 = vmatmul.msk.f32.vlgmr.msra.gmra.mxu0 %vm2233_vm0, %v2389_v33  ;;  %v2584_v33 = vor.u32 1.1754944e-38, %v2583_v62  ;;  %3288 = vset.pattern.permute.xlu2 %v3372_v9 }
 0x557   : > { %v2380_v57 = vpop.f32.mrf.mxu3 }
 0x558   : > { %v2381_v51 = vadd.f32 %v3299_v53, %v2380_v57  ;;  %v2580_v57 = vsel %vm2579_vm5, %v3331_v40, %v2576_v14 }
 0x55a   : > { %v2390_v54 = vmax.f32 %v2381_v51, 0.0  ;;  %v2590_v51 = vmul.f32 0.6931472, %v3333_v39 }
 0x55c   : > { %3166 = vmatmul.msk.f32.gmra.mxu0 %vm2233_vm0, %v2390_v54  ;;  %v2585_v54 = vsel %vm2582_vm6, %v2584_v33, %v2580_v57  ;;  %2604 = vperm.xlu1 %3287, %v2590_v51  }
 0x55f   : > { %v2383_v46 = vpop.f32.mrf.mxu3 }
 0x560   : > { %v2384_v58 = vadd.f32 %v3299_v53, %v2383_v46  ;;  %v2586_v46 = vmul.f32 %v2585_v54, %v2518_v37 }
 0x562   : > { %v2391_v22 = vmax.f32 %v2384_v58, 0.0 }
 0x564   : > { %3167 = vmatmul.msk.f32.gmra.mxu0 %vm2233_vm0, %v2391_v22 }
 0x567   : > { %v2386_v55 = vpop.f32.mrf.mxu3 }
 0x568   : > { %v2387_v56 = vadd.f32 %v3299_v53, %v2386_v55  ;;  %v2540_v53 = vsel %vm2537_vm2, %v2539_v3, %v2535_v38  ;;  %v2505_v55 = vld [vmem:[%s4217_s9 + $0x10] sm:$0xff]  ;;  %v4245_v38 = vld [vmem:[%s1203_s1] sm:$0xf] }
 0x569   : > { %v2541_v10 = vmul.f32 %v2540_v53, %v2515_v43  ;;  %v2596_v49 = vperm.slane %v4245_v38, 0  ;;  %v2625_v7 = vperm.slane %v4245_v38, 1 }
 0x56a   : > { %v2392_v48 = vmax.f32 %v2387_v56, 0.0  ;;  %v2509_v56 = vmax.f32 %v2505_v55, 0.0 }
 0x56b   : > { %3334 = vlog2.f32 %v2541_v10 }
 0x56c   : > { %3168 = vmatmul.msk.f32.gmra.mxu0 %vm2233_vm0, %v2392_v48  ;;  %3336 = vlog2.f32 %v2586_v46  ;;  %v2513_v48 = vmin.f32 %v2509_v56, 1.0 }
 0x56e   : > { %v2521_v2 = vsub.f32 1.0, %v2513_v48  ;;  %v2517_v16 = vmax.f32 %v2513_v48, 1e-05 }
 0x570   : > { %v2525_v4 = vmax.f32 %v2521_v2, 1e-05 }
 0x571   : > { %v3335_v58 = vpop.eup %3334 }
 0x572   : > { %v2588_v22 = vmul.f32 0.6931472, %v3335_v58  ;;  %v3337_v0 = vpop.eup %3336  ;;  %3338 = vrcp.f32 %v2525_v4  ;;  %vm2562_vm7 = vweird.f32 %v2525_v4  ;;  %v2568_v13 = vand.u32 2147483648, %v2525_v4 }
 0x573   : > { %v2594_v1 = vmul.f32 0.6931472, %v3337_v0  ;;  %v2566_v21 = vand.u32 2147483647, %v2525_v4 }
 0x574   : > { %2599 = vperm.xlu0 %3286, %v2588_v22   ;;  %v2569_v25 = vor.u32 1.1754944e-38, %v2568_v13 }
 0x575   : > { %2614 = vperm.xlu1 %3287, %v2594_v1   ;;  %vm2567_vm10 = vcmp.eq.f32.partialorder %v2566_v21, 8.507059e+37 }
 0x578   : > { %v3339_v11 = vpop.eup %3338 }
 0x579   : > { %v2558_v15 = vmul.f32 %v3339_v11, %v2525_v4  ;;  %vm2563_vm8 = vweird.f32 %v3339_v11 }
 0x57a   : > { %vm2564_vm9 = vmor %vm2562_vm7, %vm2563_vm8 }
 0x57b   : > { %v2559_v20 = vsub.f32 1.0, %v2558_v15 }
 0x57c   : > { %3289 = vset.pattern.permute.xlu0 %v3373_v5 }
 0x57d   : > { %2627 = vperm.xlu0 %3289, %v2588_v22   ;;  %3290 = vset.pattern.permute.xlu1 %v3373_v5  ;;  %v2560_v24 = vmul.f32 %v3339_v11, %v2559_v20 }
 0x57e   : > { %2631 = vperm.xlu1 %3290, %v2590_v51  }
 0x57f   : > { %v2561_v17 = vadd.f32 %v3339_v11, %v2560_v24 }
 0x581   : > { %v2565_v26 = vsel %vm2564_vm9, %v3339_v11, %v2561_v17 }
 0x582   : > { %v2570_v28 = vsel %vm2567_vm10, %v2569_v25, %v2565_v26 }
 0x583   : > { %v2571_v30 = vmul.f32 %v2570_v28, %v2517_v16 }
 0x585   : > { %3340 = vlog2.f32 %v2571_v30  ;;  %v4259_v30 = vld [vmem:[%s4351_s28] ss:$0 sm:$0xff] }
 0x586   : > { %2639 = vperm.xlu1 %3290, %v2594_v1  }
 0x58b   : > { %v3341_v35 = vpop.eup %3340 }
 0x58c   : > { %v2592_v40 = vmul.f32 0.6931472, %v3341_v35 }
 0x58e   : > { %2609 = vperm.xlu2 %3288, %v2592_v40  }
 0x596   : > { %3291 = vset.pattern.permute.xlu2 %v3373_v5 }
 0x597   : > { %2635 = vperm.xlu2 %3291, %v2592_v40  }
 0x5ce   : > { %v2605_v43 = vpop.permute.xlu1 %2604 }
 0x5cf   : > { %v2618_v39 = vmul.f32 %v2605_v43, %v2596_v49  ;;  %v2169_v43 = vadd.f32 %v4259_v30, %v4182_v61 }
 0x5d1   : > { %v2434_v12 = vpop.f32.mrf.mxu0 }
 0x5d2   : > { %v2435_v19 = vadd.f32 %v3300_v6, %v2434_v12 }
 0x5d4   : > { %v2446_v23 = vmax.f32 %v2435_v19, 0.0 }
 0x5d6   : > { %3169 = vmatmul.msk.f32.vlgmr.msra.gmra.mxu1 %vm2233_vm0, %v2446_v23 }
 0x5d9   : > { %v2437_v27 = vpop.f32.mrf.mxu0 }
 0x5da   : > { %v2438_v29 = vadd.f32 %v3300_v6, %v2437_v27 }
 0x5dc   : > { %v2447_v31 = vmax.f32 %v2438_v29, 0.0 }
 0x5de   : > { %3170 = vmatmul.msk.f32.gmra.mxu1 %vm2233_vm0, %v2447_v31  ;;  %v4262_v31 = vperm.slane %v4245_v38, 2 }
 0x5e1   : > { %v2440_v34 = vpop.f32.mrf.mxu0 }
 0x5e2   : > { %v2441_v36 = vadd.f32 %v3300_v6, %v2440_v34 }
 0x5e4   : > { %v2448_v41 = vmax.f32 %v2441_v36, 0.0 }
 0x5e6   : > { %3171 = vmatmul.msk.f32.gmra.mxu1 %vm2233_vm0, %v2448_v41  ;;  %v2600_v47 = vpop.permute.xlu0 %2599 }
 0x5e7   : > { %v2615_v3 = vpop.permute.xlu1 %2614  ;;  %v2617_v53 = vmul.f32 %v2600_v47, %v2596_v49  ;;  %v2735_v47 = vperm.slane %v4245_v38, 3 }
 0x5e8   : > { %v2610_v9 = vpop.permute.xlu2 %2609  ;;  %v2620_v20 = vmul.f32 %v2615_v3, %v2596_v49 }
 0x5e9   : > { %v2443_v42 = vpop.f32.mrf.mxu0  ;;  %v2619_v56 = vmul.f32 %v2610_v9, %v2596_v49 }
 0x5ea   : > { %v2444_v44 = vadd.f32 %v3300_v6, %v2443_v42 }
 0x5ec   : > { %v2449_v45 = vmax.f32 %v2444_v44, 0.0 }
 0x5ee   : > { %3172 = vmatmul.msk.f32.gmra.mxu1 %vm2233_vm0, %v2449_v45 }
 0x5ef   : > { %v2628_v8 = vpop.permute.xlu0 %2627 }
 0x5f0   : > { %v2642_v62 = vmul.f32 %v2628_v8, %v2625_v7  ;;  %v2632_v33 = vpop.permute.xlu1 %2631 }
 0x5f1   : > { %v2643_v51 = vmul.f32 %v2632_v33, %v2625_v7  ;;  %v2636_v58 = vpop.permute.xlu2 %2635 }
 0x5f2   : > { %v2644_v2 = vmul.f32 %v2636_v58, %v2625_v7 }
 0x5f8   : > { %v2640_v13 = vpop.permute.xlu1 %2639 }
 0x5f9   : > { %v2645_v25 = vmul.f32 %v2640_v13, %v2625_v7 }
 0x653   : > { %v2491_v59 = vpop.f32.mrf.mxu1 }
 0x654   : > { %v2492_v10 = vadd.f32 %v3301_v60, %v2491_v59 }
 0x656   : > { %v2621_v63 = vadd.f32 %v2617_v53, %v2492_v10 }
 0x658   : > { %v2646_v32 = vadd.f32 %v2642_v62, %v2621_v63 }
 0x65a   : > { %v3173_v37 = vmul.f32 -1.442695, %v2646_v32 }
 0x65b   : > { %v2494_v14 = vpop.f32.mrf.mxu1 }
 0x65c   : > { %3342 = vpow2.f32 %v3173_v37  ;;  %v2495_v57 = vadd.f32 %v3301_v60, %v2494_v14  ;;  %v2172_v37 = vadd.f32 %v4259_v30, %v4185_v50 }
 0x65e   : > { %v2622_v54 = vadd.f32 %v2618_v39, %v2495_v57 }
 0x660   : > { %v2647_v46 = vadd.f32 %v2643_v51, %v2622_v54 }
 0x662   : > { %v3343_v22 = vpop.eup %3342  ;;  %v3174_v55 = vmul.f32 -1.442695, %v2647_v46 }
 0x663   : > { %v2662_v48 = vadd.f32 1.0, %v3343_v22  ;;  %v2497_v0 = vpop.f32.mrf.mxu1 }
 0x664   : > { %3344 = vpow2.f32 %v3174_v55  ;;  %v2498_v1 = vadd.f32 %v3301_v60, %v2497_v0 }
 0x665   : > { %3346 = vrcp.f32 %v2662_v48  ;;  %v2677_v17 = vand.u32 2147483648, %v2662_v48  ;;  %v2675_v27 = vand.u32 2147483647, %v2662_v48  ;;  %vm2671_vm11 = vweird.f32 %v2662_v48 }
 0x666   : > { %v2623_v4 = vadd.f32 %v2619_v56, %v2498_v1  ;;  %v2175_v1 = vadd.f32 %v4259_v30, %v4187_v18  ;;  %v2178_v18 = vadd.f32 %v4259_v30, %v4189_v52 }
 0x667   : > { %v2678_v40 = vor.u32 1.1754944e-38, %v2677_v17  ;;  %vm2676_vm13 = vcmp.eq.f32.partialorder %v2675_v27, 8.507059e+37 }
 0x668   : > { %v2648_v5 = vadd.f32 %v2644_v2, %v2623_v4 }
 0x66a   : > { %v3345_v6 = vpop.eup %3344  ;;  %v3175_v11 = vmul.f32 -1.442695, %v2648_v5 }
 0x66b   : > { %v3347_v15 = vpop.eup %3346  ;;  %v2663_v12 = vadd.f32 1.0, %v3345_v6  ;;  %v2500_v19 = vpop.f32.mrf.mxu1 }
 0x66c   : > { %v2667_v21 = vmul.f32 %v3347_v15, %v2662_v48  ;;  %3348 = vpow2.f32 %v3175_v11  ;;  %v2501_v23 = vadd.f32 %v3301_v60, %v2500_v19  ;;  %vm2672_vm0 = vweird.f32 %v3347_v15 }
 0x66d   : > { %3350 = vrcp.f32 %v2663_v12  ;;  %vm2673_vm12 = vmor %vm2671_vm11, %vm2672_vm0  ;;  %v2692_v60 = vand.u32 2147483648, %v2663_v12  ;;  %v2690_v53 = vand.u32 2147483647, %v2663_v12  ;;  %vm2686_vm15 = vweird.f32 %v2663_v12 }
 0x66e   : > { %v2668_v24 = vsub.f32 1.0, %v2667_v21  ;;  %v2624_v16 = vadd.f32 %v2620_v20, %v2501_v23 }
 0x66f   : > { %v2693_v38 = vor.u32 1.1754944e-38, %v2692_v60  ;;  %vm2691_vm2 = vcmp.eq.f32.partialorder %v2690_v53, 8.507059e+37 }
 0x670   : > { %v2669_v26 = vmul.f32 %v3347_v15, %v2668_v24  ;;  %v2649_v28 = vadd.f32 %v2645_v25, %v2624_v16 }
 0x672   : > { %v3349_v29 = vpop.eup %3348  ;;  %v2670_v34 = vadd.f32 %v3347_v15, %v2669_v26  ;;  %v3176_v35 = vmul.f32 -1.442695, %v2649_v28 }
 0x673   : > { %v3351_v36 = vpop.eup %3350  ;;  %v2664_v41 = vadd.f32 1.0, %v3349_v29 }
 0x674   : > { %v2674_v42 = vsel %vm2673_vm12, %v3347_v15, %v2670_v34  ;;  %v2682_v44 = vmul.f32 %v3351_v36, %v2663_v12  ;;  %3352 = vpow2.f32 %v3176_v35  ;;  %vm2687_vm14 = vweird.f32 %v3351_v36 }
 0x675   : > { %v2679_v45 = vsel %vm2676_vm13, %v2678_v40, %v2674_v42  ;;  %3354 = vrcp.f32 %v2664_v41  ;;  %vm2688_vm1 = vmor %vm2686_vm15, %vm2687_vm14  ;;  %v2707_v57 = vand.u32 2147483648, %v2664_v41  ;;  %v2705_v46 = vand.u32 2147483647, %v2664_v41 }
 0x676   : > { %v2727_v49 = vmul.f32 %v4262_v31, %v2679_v45  ;;  %v2683_v3 = vsub.f32 1.0, %v2682_v44  ;;  %vm2701_vm4 = vweird.f32 %v2664_v41 }
 0x677   : > { %v2708_v56 = vor.u32 1.1754944e-38, %v2707_v57  ;;  %vm2706_vm6 = vcmp.eq.f32.partialorder %v2705_v46, 8.507059e+37 }
 0x678   : > { %v2731_v7 = vadd.f32 %v2727_v49, %v2169_v43  ;;  %v2684_v8 = vmul.f32 %v3351_v36, %v2683_v3 }
 0x67a   : > { %v3353_v59 = vpop.eup %3352  ;;  %v2736_v10 = vadd.f32 %v2735_v47, %v2731_v7  ;;  %v2685_v62 = vadd.f32 %v3351_v36, %v2684_v8 }
 0x67b   : > { %v3355_v61 = vpop.eup %3354  ;;  %v2665_v63 = vadd.f32 1.0, %v3353_v59 }
 0x67c   : > { %2740 = vst [vmem:[%s4272_s11] sm:$0xff] %v2736_v10  ;;  %v2689_v9 = vsel %vm2688_vm1, %v3351_v36, %v2685_v62  ;;  %v2697_v32 = vmul.f32 %v3355_v61, %v2664_v41  ;;  %vm2702_vm3 = vweird.f32 %v3355_v61 }
 0x67d   : > { %v2694_v33 = vsel %vm2691_vm2, %v2693_v38, %v2689_v9  ;;  %3356 = vrcp.f32 %v2665_v63  ;;  %vm2703_vm5 = vmor %vm2701_vm4, %vm2702_vm3  ;;  %v2722_v5 = vand.u32 2147483648, %v2665_v63  ;;  %v2720_v15 = vand.u32 2147483647, %v2665_v63 }
 0x67e   : > { %v2728_v14 = vmul.f32 %v4262_v31, %v2694_v33  ;;  %v2698_v39 = vsub.f32 1.0, %v2697_v32  ;;  %vm2716_vm8 = vweird.f32 %v2665_v63 }
 0x67f   : > { %v2723_v19 = vor.u32 1.1754944e-38, %v2722_v5  ;;  %vm2721_vm10 = vcmp.eq.f32.partialorder %v2720_v15, 8.507059e+37 }
 0x680   : > { %v2732_v51 = vadd.f32 %v2728_v14, %v2172_v37  ;;  %v2699_v54 = vmul.f32 %v3355_v61, %v2698_v39 }
 0x682   : > { %v2737_v58 = vadd.f32 %v2735_v47, %v2732_v51  ;;  %v2700_v22 = vadd.f32 %v3355_v61, %v2699_v54 }
 0x683   : > { %v3357_v55 = vpop.eup %3356 }
 0x684   : > { %2741 = vst [vmem:[%s4272_s11 + $0x8] sm:$0xff] %v2737_v58  ;;  %v2704_v48 = vsel %vm2703_vm5, %v3355_v61, %v2700_v22  ;;  %v2712_v0 = vmul.f32 %v3357_v55, %v2665_v63  ;;  %vm2717_vm7 = vweird.f32 %v3357_v55 }
 0x685   : > { %v2709_v50 = vsel %vm2706_vm6, %v2708_v56, %v2704_v48  ;;  %vm2718_vm9 = vmor %vm2716_vm8, %vm2717_vm7 }
 0x686   : > { %v2729_v2 = vmul.f32 %v4262_v31, %v2709_v50  ;;  %v2713_v4 = vsub.f32 1.0, %v2712_v0 }
 0x688   : > { %v2733_v6 = vadd.f32 %v2729_v2, %v2175_v1  ;;  %v2714_v11 = vmul.f32 %v3357_v55, %v2713_v4 }
 0x68a   : > { %v2738_v12 = vadd.f32 %v2735_v47, %v2733_v6  ;;  %v2715_v13 = vadd.f32 %v3357_v55, %v2714_v11 }
 0x68c   : > { %2742 = vst [vmem:[%s4272_s11 + $0x10] sm:$0xff] %v2738_v12  ;;  %v2719_v20 = vsel %vm2718_vm9, %v3357_v55, %v2715_v13 }
 0x68d   : > { %v2724_v21 = vsel %vm2721_vm10, %v2723_v19, %v2719_v20 }
 0x68e   : > { %v2730_v23 = vmul.f32 %v4262_v31, %v2724_v21 }
 0x690   : > { %v2734_v24 = vadd.f32 %v2730_v23, %v2178_v18 }
 0x692   : > { %v2739_v25 = vadd.f32 %v2735_v47, %v2734_v24 }
 0x694   : > { %2743 = vst [vmem:[%s4272_s11 + $0x18] sm:$0xff] %v2739_v25 }
 0x695 PF: > { %s4352_s2 = sld [smem:[#allocation2_spill]] }
 0x69b   : > { %s36_s27 = sadd.s32 1, %s4352_s2  }
 0x69c   : > { %p33_p4 = scmp.ge.s32.totalorder %s36_s27, 4  }
 0x69e   :  { %35 = sbr.rel (!%p33_p4) target bundleno = 13 (0xd), region = 226 }

</bundles_post_ra>
